<compile_context>
chip_gen: v7x
topology: tpu7x:2x2x1
jax: 0.10.0
libtpu: 0.0.40
codegen_flags: <defaults>
</compile_context>

<pallas_src>
import math

import jax
import jax.numpy as jnp
from jax.experimental import pallas as pl
from jax.experimental.pallas import tpu as pltpu

D_MODEL = 32
N_HEADS = 4
HEAD_DIM = D_MODEL // N_HEADS
EPS = 1e-6
MASK_NEG = 1e9

# ---- packed-parameter layout -------------------------------------------------
# weight slab columns (each matrix is D_MODEL columns wide):
#   [Wq1|Wk1|Wv1|Wo1 | Wq2|Wk2|Wv2|Wo2 | Wff1|Wff2]
_W_SELF = 0 * D_MODEL
_W_CROSS = 4 * D_MODEL
_W_FF1 = 8 * D_MODEL
_W_FF2 = 9 * D_MODEL
N_WMATS = 10

# param slab rows:
_R_LN1_G, _R_LN1_B, _R_LN2_G, _R_LN2_B, _R_LN3_G, _R_LN3_B = range(6)
_R_B_SELF = 6          # bq1, bk1, bv1, bo1
_R_B_CROSS = 10        # bq2, bk2, bv2, bo2
_R_B_FF1, _R_B_FF2 = 14, 15
N_PROWS = 16


# ------------------------------------------------------------------ fused kernel
def _decoder_layer_kernel(x_ref, enc_ref, wslab_ref, pslab_ref, o_ref):
    x = x_ref[...].astype(jnp.float32)        # (B, Sq, D)
    enc = enc_ref[...].astype(jnp.float32)    # (B, Sk, D)
    B, Sq, D = x.shape

    def ln(v, g_row, b_row):
        g = pslab_ref[g_row:g_row + 1, :]     # (1, D) static Ref slice
        b = pslab_ref[b_row:b_row + 1, :]
        mean = jnp.mean(v, axis=-1, keepdims=True)
        var = jnp.mean((v - mean) ** 2, axis=-1, keepdims=True)
        return (v - mean) * jax.lax.rsqrt(var + EPS) * g + b

    def mha(xq, xkv, w_base, b_base, causal):
        """Head-batched multi-head attention.

        xq: (B, Sq, D) query stream; xkv: (B, Sk, D) key/value stream.
        w_base / b_base: column / row base of this block's [Wq|Wk|Wv|Wo] /
        [bq,bk,bv,bo] inside the packed slabs.
        """
        Bq, Sq_, _ = xq.shape
        Sk_ = xkv.shape[1]
        xq_f = xq.reshape(Bq * Sq_, D)
        xkv_f = xkv.reshape(Bq * Sk_, D)

        # Three full-width projections against static Ref slices of the weight
        # slab: results are lane-aligned at offset 0 (no slicing of MXU output
        # other than the head fold below).
        q = (jnp.dot(xq_f, wslab_ref[:, w_base:w_base + D],
                     preferred_element_type=jnp.float32)
             + pslab_ref[b_base:b_base + 1, :]).reshape(Bq, Sq_, D)
        k = (jnp.dot(xkv_f, wslab_ref[:, w_base + D:w_base + 2 * D],
                     preferred_element_type=jnp.float32)
             + pslab_ref[b_base + 1:b_base + 2, :]).reshape(Bq, Sk_, D)
        v = (jnp.dot(xkv_f, wslab_ref[:, w_base + 2 * D:w_base + 3 * D],
                     preferred_element_type=jnp.float32)
             + pslab_ref[b_base + 2:b_base + 3, :]).reshape(Bq, Sk_, D)

        # Fold heads into the batch dim (index = h*B + b): lane windows stacked
        # along the OUTER axis.  Same physical relayout as a 4-D transpose but
        # expressed with ops that are guaranteed to lower at sub-tile shapes.
        def fold(t):
            return jnp.concatenate(
                [t[:, :, h * HEAD_DIM:(h + 1) * HEAD_DIM]
                 for h in range(N_HEADS)], axis=0)

        qh, kh, vh = fold(q), fold(k), fold(v)          # (B*H, S, hd)

        s = jnp.einsum('bqd,bkd->bqk', qh, kh,
                       preferred_element_type=jnp.float32)
        s = s * (1.0 / math.sqrt(HEAD_DIM))
        if causal:
            qi = jax.lax.broadcasted_iota(jnp.int32, (Sq_, Sk_), 0)
            ki = jax.lax.broadcasted_iota(jnp.int32, (Sq_, Sk_), 1)
            # exact torch masked_fill(mask == 0, -1e9) semantics
            s = jnp.where((qi >= ki)[None, :, :], s, -MASK_NEG)
        s = s - jnp.max(s, axis=-1, keepdims=True)
        p = jnp.exp(s)
        p = p * pl.reciprocal(jnp.sum(p, axis=-1, keepdims=True), approx=True)
        o_bh = jnp.einsum('bqk,bkd->bqd', p, vh,
                          preferred_element_type=jnp.float32)  # (B*H, Sq, hd)

        # Un-fold + Wo in one shot: per-head partial products against the
        # row-sliced Wo block (no lane-axis concatenate of head outputs).
        wo_col = w_base + 3 * D
        acc = None
        for h in range(N_HEADS):
            o_h = o_bh[h * Bq:(h + 1) * Bq].reshape(Bq * Sq_, HEAD_DIM)
            part = jnp.dot(
                o_h,
                wslab_ref[h * HEAD_DIM:(h + 1) * HEAD_DIM, wo_col:wo_col + D],
                preferred_element_type=jnp.float32)
            acc = part if acc is None else acc + part
        acc = acc + pslab_ref[b_base + 3:b_base + 4, :]
        return acc.reshape(Bq, Sq_, D)

    # ---- block 1: x = x + SelfAttn(LN1(x)), causal target mask -------------
    x2 = ln(x, _R_LN1_G, _R_LN1_B)
    x = x + mha(x2, x2, _W_SELF, _R_B_SELF, causal=True)

    # ---- block 2: x = x + CrossAttn(LN2(x), enc), unmasked source ----------
    x2 = ln(x, _R_LN2_G, _R_LN2_B)
    x = x + mha(x2, enc, _W_CROSS, _R_B_CROSS, causal=False)

    # ---- block 3: x = x + FFN(LN3(x))  (Linear -> ReLU -> Linear) ----------
    x2 = ln(x, _R_LN3_G, _R_LN3_B)
    x2f = x2.reshape(B * Sq, D)
    h = jnp.dot(x2f, wslab_ref[:, _W_FF1:_W_FF1 + D],
                preferred_element_type=jnp.float32) + pslab_ref[_R_B_FF1:_R_B_FF1 + 1, :]
    h = jnp.maximum(h, 0.0)
    y = jnp.dot(h, wslab_ref[:, _W_FF2:_W_FF2 + D],
                preferred_element_type=jnp.float32) + pslab_ref[_R_B_FF2:_R_B_FF2 + 1, :]
    x = x + y.reshape(B, Sq, D)

    o_ref[...] = x.astype(o_ref.dtype)


# ----------------------------------------------------------------------- wrapper
def decoder_transformer_layer(x, enc_outputs, wslab, pslab):
    B, Sq, D = x.shape
    Sk = enc_outputs.shape[1]
    assert D == D_MODEL
    assert wslab.shape == (D, N_WMATS * D) and pslab.shape == (N_PROWS, D)

    def mm(m, k, n):  # flops of an (m,k)@(k,n) matmul
        return 2 * m * k * n

    BH = B * N_HEADS
    flops = (
        3 * mm(B * Sq, D, D)                                    # self Q/K/V
        + mm(B * Sq, D, D) + 2 * mm(B * Sk, D, D)               # cross Q / K / V
        + mm(BH * Sq, HEAD_DIM, Sq) + mm(BH * Sq, Sq, HEAD_DIM)  # self scores/pv
        + mm(BH * Sq, HEAD_DIM, Sk) + mm(BH * Sq, Sk, HEAD_DIM)  # cross scores/pv
        + 2 * mm(B * Sq, D, D)                                  # two Wo
        + 2 * mm(B * Sq, D, D))                                 # FFN (hidden == D)
    transcendentals = (BH * Sq * (Sq + Sk)     # exp
                       + 3 * B * Sq            # rsqrt (3 LayerNorms)
                       + 2 * BH * Sq)          # softmax reciprocals

    args = (x, enc_outputs, wslab, pslab)
    bytes_accessed = (sum(a.size * a.dtype.itemsize for a in args)
                      + x.size * x.dtype.itemsize)

    # Single call, no grid: the whole working set (< 64 KB) lives in VMEM on
    # v5e/v6e/v7x with huge headroom; a grid at this size is pure per-step
    # overhead.  (If B/S grow, add grid=(B,) + dimension_semantics=("parallel",)
    # to use both v7x TensorCores, and bf16 weights for the MXU.)
    return pl.pallas_call(
        _decoder_layer_kernel,
        out_shape=jax.ShapeDtypeStruct((B, Sq, D), x.dtype),
        in_specs=[pl.BlockSpec(memory_space=pltpu.MemorySpace.VMEM)] * len(args),
        out_specs=pl.BlockSpec(memory_space=pltpu.MemorySpace.VMEM),
        input_output_aliases={0: 0},            # output reuses x's buffer
        cost_estimate=pl.CostEstimate(
            flops=flops,
            transcendentals=transcendentals,
            bytes_accessed=bytes_accessed),
    )(*args)


# ---------------------------------------------------------------- pure-JAX ref
def _reference_layer(x, enc, source_mask, target_mask, wslab, pslab):
    D = D_MODEL
    W = lambda i: wslab[:, i * D:(i + 1) * D]
    P = lambda i: pslab[i]

    def ln(v, g, b):
        mean = jnp.mean(v, -1, keepdims=True)
        var = jnp.mean((v - mean) ** 2, -1, keepdims=True)
        return (v - mean) / jnp.sqrt(var + EPS) * g + b

    def mha(xq, xkv, mask, wq, wk, wv, wo, bq, bk, bv, bo):
        B, Sq, _ = xq.shape
        Sk = xkv.shape[1]
        q = (xq @ wq + bq).reshape(B, Sq, N_HEADS, HEAD_DIM).transpose(0, 2, 1, 3)
        k = (xkv @ wk + bk).reshape(B, Sk, N_HEADS, HEAD_DIM).transpose(0, 2, 1, 3)
        v = (xkv @ wv + bv).reshape(B, Sk, N_HEADS, HEAD_DIM).transpose(0, 2, 1, 3)
        s = jnp.einsum('bhqd,bhkd->bhqk', q, k) / math.sqrt(HEAD_DIM)
        if mask is not None:
            s = jnp.where(mask[:, None] > 0, s, -MASK_NEG)
        a = jax.nn.softmax(s, axis=-1)
        o = jnp.einsum('bhqk,bhkd->bhqd', a, v)
        o = o.transpose(0, 2, 1, 3).reshape(B, Sq, -1)
        return o @ wo + bo

    x2 = ln(x, P(_R_LN1_G), P(_R_LN1_B))
    x = x + mha(x2, x2, target_mask, W(0), W(1), W(2), W(3),
                P(6), P(7), P(8), P(9))
    x2 = ln(x, P(_R_LN2_G), P(_R_LN2_B))
    x = x + mha(x2, enc, source_mask, W(4), W(5), W(6), W(7),
                P(10), P(11), P(12), P(13))
    x2 = ln(x, P(_R_LN3_G), P(_R_LN3_B))
    h = jnp.maximum(x2 @ W(8) + P(_R_B_FF1), 0.0)
    x = x + (h @ W(9) + P(_R_B_FF2))
    return x


# ---------------------------------------------------------------------- params
def init_params(key, d_model=D_MODEL):
    """Packed params: wslab (D, 10D) and pslab (16, D).  Weights are in
    (in_features, out_features) layout (transpose of torch Linear.weight)."""
    kw, kb = jax.random.split(key)
    s = 0.02
    wkeys = jax.random.split(kw, N_WMATS)
    mats = [jax.random.normal(k, (d_model, d_model), jnp.float32) * s
            for k in wkeys]
    wslab = jnp.concatenate(mats, axis=1)                    # (D, 10*D)

    bkeys = jax.random.split(kb, N_PROWS)
    rows = []
    for i in range(6):                                       # LN gamma / beta
        if i % 2 == 0:
            rows.append(1.0 + 0.1 * jax.random.normal(bkeys[i], (d_model,),
                                                      jnp.float32))
        else:
            rows.append(0.1 * jax.random.normal(bkeys[i], (d_model,),
                                                jnp.float32))
    for i in range(6, N_PROWS):                              # linear biases
        rows.append(0.02 * jax.random.normal(bkeys[i], (d_model,),
                                             jnp.float32))
    pslab = jnp.stack(rows, axis=0)                          # (16, D)
    return {"wslab": wslab, "pslab": pslab}


if __name__ == "__main__":
    B, S_TGT, S_SRC = 2, 8, 8

    key = jax.random.PRNGKey(0)
    kx, ko, kp = jax.random.split(key, 3)

    x = jax.random.normal(kx, (B, S_TGT, D_MODEL), jnp.float32)
    enc = jax.random.normal(ko, (B, S_SRC, D_MODEL), jnp.float32)
    params = init_params(kp, D_MODEL)

    out = decoder_transformer_layer(x, enc, params["wslab"], params["pslab"])
    out = jax.block_until_ready(out)
    assert out.shape == (B, S_TGT, D_MODEL)

    # Reference uses explicit masks matching what the kernel generates
    # in-kernel: causal target mask, all-ones (no-op) source mask.
    target_mask = jnp.broadcast_to(
        jnp.tril(jnp.ones((S_TGT, S_TGT), jnp.float32)), (B, S_TGT, S_TGT))
    source_mask = jnp.ones((B, S_TGT, S_SRC), jnp.float32)
    ref = _reference_layer(x, enc, source_mask, target_mask,
                           params["wslab"], params["pslab"])

    max_err = float(jnp.max(jnp.abs(out - ref)))
    assert max_err < 1e-2, f"kernel vs reference max abs error: {max_err}"

    print("KERNEL_OK")
</pallas_src>

<mosaic_0001>
module attributes {stable_mosaic.version = 11 : i64} {
  func.func @_decoder_layer_kernel(%arg0: memref<2x8x32xf32, #tpu.memory_space<vmem>>, %arg1: memref<2x8x32xf32, #tpu.memory_space<vmem>>, %arg2: memref<32x320xf32, #tpu.memory_space<vmem>>, %arg3: memref<16x32xf32, #tpu.memory_space<vmem>>, %arg4: memref<2x8x32xf32, #tpu.memory_space<vmem>>) attributes {dimension_semantics = [], scalar_prefetch = 0 : i64, scratch_operands = 0 : i64, tpu.core_type = #tpu.core_type<tc>} {
    %c0 = arith.constant 0 : index
    %c0_0 = arith.constant 0 : index
    %c0_1 = arith.constant 0 : index
    %0 = vector.load %arg0[%c0, %c0_0, %c0_1] : memref<2x8x32xf32, #tpu.memory_space<vmem>>, vector<2x8x32xf32>
    %c0_2 = arith.constant 0 : index
    %c0_3 = arith.constant 0 : index
    %c0_4 = arith.constant 0 : index
    %1 = vector.load %arg1[%c0_2, %c0_3, %c0_4] : memref<2x8x32xf32, #tpu.memory_space<vmem>>, vector<2x8x32xf32>
    %c0_5 = arith.constant 0 : index
    %c0_6 = arith.constant 0 : index
    %2 = vector.load %arg3[%c0_5, %c0_6] : memref<16x32xf32, #tpu.memory_space<vmem>>, vector<1x32xf32>
    %c1 = arith.constant 1 : index
    %c0_7 = arith.constant 0 : index
    %3 = vector.load %arg3[%c1, %c0_7] : memref<16x32xf32, #tpu.memory_space<vmem>>, vector<1x32xf32>
    %cst = arith.constant dense<0.000000e+00> : vector<2x8xf32>
    %4 = vector.multi_reduction <add>, %0, %cst [2] : vector<2x8x32xf32> to vector<2x8xf32>
    %5 = vector.shape_cast %4 : vector<2x8xf32> to vector<2x8x1xf32>
    %cst_8 = arith.constant 3.200000e+01 : f32
    %6 = vector.broadcast %cst_8 : f32 to vector<2x8x1xf32>
    %7 = arith.divf %5, %6 : vector<2x8x1xf32>
    %8 = vector.broadcast %7 : vector<2x8x1xf32> to vector<2x8x32xf32>
    %9 = arith.subf %0, %8 : vector<2x8x32xf32>
    %10 = arith.mulf %9, %9 : vector<2x8x32xf32>
    %cst_9 = arith.constant dense<0.000000e+00> : vector<2x8xf32>
    %11 = vector.multi_reduction <add>, %10, %cst_9 [2] : vector<2x8x32xf32> to vector<2x8xf32>
    %12 = vector.shape_cast %11 : vector<2x8xf32> to vector<2x8x1xf32>
    %cst_10 = arith.constant 3.200000e+01 : f32
    %13 = vector.broadcast %cst_10 : f32 to vector<2x8x1xf32>
    %14 = arith.divf %12, %13 : vector<2x8x1xf32>
    %15 = vector.broadcast %7 : vector<2x8x1xf32> to vector<2x8x32xf32>
    %16 = arith.subf %0, %15 : vector<2x8x32xf32>
    %cst_11 = arith.constant 9.99999997E-7 : f32
    %17 = vector.broadcast %cst_11 : f32 to vector<2x8x1xf32>
    %18 = arith.addf %14, %17 : vector<2x8x1xf32>
    %19 = math.rsqrt %18 : vector<2x8x1xf32>
    %20 = vector.broadcast %19 : vector<2x8x1xf32> to vector<2x8x32xf32>
    %21 = arith.mulf %16, %20 : vector<2x8x32xf32>
    %22 = vector.shape_cast %2 : vector<1x32xf32> to vector<1x1x32xf32>
    %23 = vector.broadcast %22 : vector<1x1x32xf32> to vector<2x8x32xf32>
    %24 = arith.mulf %21, %23 : vector<2x8x32xf32>
    %25 = vector.shape_cast %3 : vector<1x32xf32> to vector<1x1x32xf32>
    %26 = vector.broadcast %25 : vector<1x1x32xf32> to vector<2x8x32xf32>
    %27 = arith.addf %24, %26 : vector<2x8x32xf32>
    %28 = vector.shape_cast %27 : vector<2x8x32xf32> to vector<16x32xf32>
    %29 = vector.shape_cast %27 : vector<2x8x32xf32> to vector<16x32xf32>
    %c0_12 = arith.constant 0 : index
    %c0_13 = arith.constant 0 : index
    %30 = vector.load %arg2[%c0_12, %c0_13] : memref<32x320xf32, #tpu.memory_space<vmem>>, vector<32x32xf32>
    %cst_14 = arith.constant dense<0.000000e+00> : vector<16x32xf32>
    %31 = tpu.matmul %28, %30, %cst_14 {dimension_numbers = #tpu.dot_dimension_numbers<[1], [0], [0], [1], [0, 0, 1, 1], [], []>} : vector<16x32xf32>, vector<32x32xf32>, vector<16x32xf32> -> vector<16x32xf32>
    %c6 = arith.constant 6 : index
    %c0_15 = arith.constant 0 : index
    %32 = vector.load %arg3[%c6, %c0_15] : memref<16x32xf32, #tpu.memory_space<vmem>>, vector<1x32xf32>
    %33 = vector.broadcast %32 : vector<1x32xf32> to vector<16x32xf32>
    %34 = arith.addf %31, %33 : vector<16x32xf32>
    %35 = vector.shape_cast %34 : vector<16x32xf32> to vector<2x8x32xf32>
    %c0_16 = arith.constant 0 : index
    %c32 = arith.constant 32 : index
    %36 = vector.load %arg2[%c0_16, %c32] : memref<32x320xf32, #tpu.memory_space<vmem>>, vector<32x32xf32>
    %cst_17 = arith.constant dense<0.000000e+00> : vector<16x32xf32>
    %37 = tpu.matmul %29, %36, %cst_17 {dimension_numbers = #tpu.dot_dimension_numbers<[1], [0], [0], [1], [0, 0, 1, 1], [], []>} : vector<16x32xf32>, vector<32x32xf32>, vector<16x32xf32> -> vector<16x32xf32>
    %c7 = arith.constant 7 : index
    %c0_18 = arith.constant 0 : index
    %38 = vector.load %arg3[%c7, %c0_18] : memref<16x32xf32, #tpu.memory_space<vmem>>, vector<1x32xf32>
    %39 = vector.broadcast %38 : vector<1x32xf32> to vector<16x32xf32>
    %40 = arith.addf %37, %39 : vector<16x32xf32>
    %41 = vector.shape_cast %40 : vector<16x32xf32> to vector<2x8x32xf32>
    %c0_19 = arith.constant 0 : index
    %c64 = arith.constant 64 : index
    %42 = vector.load %arg2[%c0_19, %c64] : memref<32x320xf32, #tpu.memory_space<vmem>>, vector<32x32xf32>
    %cst_20 = arith.constant dense<0.000000e+00> : vector<16x32xf32>
    %43 = tpu.matmul %29, %42, %cst_20 {dimension_numbers = #tpu.dot_dimension_numbers<[1], [0], [0], [1], [0, 0, 1, 1], [], []>} : vector<16x32xf32>, vector<32x32xf32>, vector<16x32xf32> -> vector<16x32xf32>
    %c8 = arith.constant 8 : index
    %c0_21 = arith.constant 0 : index
    %44 = vector.load %arg3[%c8, %c0_21] : memref<16x32xf32, #tpu.memory_space<vmem>>, vector<1x32xf32>
    %45 = vector.broadcast %44 : vector<1x32xf32> to vector<16x32xf32>
    %46 = arith.addf %43, %45 : vector<16x32xf32>
    %47 = vector.shape_cast %46 : vector<16x32xf32> to vector<2x8x32xf32>
    %48 = vector.extract_strided_slice %35 {offsets = [0, 0, 0], sizes = [2, 8, 8], strides = [1, 1, 1]} : vector<2x8x32xf32> to vector<2x8x8xf32>
    %49 = vector.extract_strided_slice %35 {offsets = [0, 0, 8], sizes = [2, 8, 8], strides = [1, 1, 1]} : vector<2x8x32xf32> to vector<2x8x8xf32>
    %50 = vector.extract_strided_slice %35 {offsets = [0, 0, 16], sizes = [2, 8, 8], strides = [1, 1, 1]} : vector<2x8x32xf32> to vector<2x8x8xf32>
    %51 = vector.extract_strided_slice %35 {offsets = [0, 0, 24], sizes = [2, 8, 8], strides = [1, 1, 1]} : vector<2x8x32xf32> to vector<2x8x8xf32>
    %52 = tpu.concatenate %48, %49, %50, %51 in 0 : vector<2x8x8xf32>, vector<2x8x8xf32>, vector<2x8x8xf32>, vector<2x8x8xf32> -> vector<8x8x8xf32>
    %53 = vector.extract_strided_slice %41 {offsets = [0, 0, 0], sizes = [2, 8, 8], strides = [1, 1, 1]} : vector<2x8x32xf32> to vector<2x8x8xf32>
    %54 = vector.extract_strided_slice %41 {offsets = [0, 0, 8], sizes = [2, 8, 8], strides = [1, 1, 1]} : vector<2x8x32xf32> to vector<2x8x8xf32>
    %55 = vector.extract_strided_slice %41 {offsets = [0, 0, 16], sizes = [2, 8, 8], strides = [1, 1, 1]} : vector<2x8x32xf32> to vector<2x8x8xf32>
    %56 = vector.extract_strided_slice %41 {offsets = [0, 0, 24], sizes = [2, 8, 8], strides = [1, 1, 1]} : vector<2x8x32xf32> to vector<2x8x8xf32>
    %57 = tpu.concatenate %53, %54, %55, %56 in 0 : vector<2x8x8xf32>, vector<2x8x8xf32>, vector<2x8x8xf32>, vector<2x8x8xf32> -> vector<8x8x8xf32>
    %58 = vector.extract_strided_slice %47 {offsets = [0, 0, 0], sizes = [2, 8, 8], strides = [1, 1, 1]} : vector<2x8x32xf32> to vector<2x8x8xf32>
    %59 = vector.extract_strided_slice %47 {offsets = [0, 0, 8], sizes = [2, 8, 8], strides = [1, 1, 1]} : vector<2x8x32xf32> to vector<2x8x8xf32>
    %60 = vector.extract_strided_slice %47 {offsets = [0, 0, 16], sizes = [2, 8, 8], strides = [1, 1, 1]} : vector<2x8x32xf32> to vector<2x8x8xf32>
    %61 = vector.extract_strided_slice %47 {offsets = [0, 0, 24], sizes = [2, 8, 8], strides = [1, 1, 1]} : vector<2x8x32xf32> to vector<2x8x8xf32>
    %62 = tpu.concatenate %58, %59, %60, %61 in 0 : vector<2x8x8xf32>, vector<2x8x8xf32>, vector<2x8x8xf32>, vector<2x8x8xf32> -> vector<8x8x8xf32>
    "tpu.trace_start"() <{level = 10 : i32, message = "bqd,bkd->bqk"}> : () -> ()
    %cst_22 = arith.constant dense<0.000000e+00> : vector<8x8x8xf32>
    %63 = tpu.matmul %52, %57, %cst_22 {dimension_numbers = #tpu.dot_dimension_numbers<[2], [2], [1], [1], [0, 0, 0, 1, 1, 1], [0], [0]>} : vector<8x8x8xf32>, vector<8x8x8xf32>, vector<8x8x8xf32> -> vector<8x8x8xf32>
    "tpu.trace_stop"() : () -> ()
    %cst_23 = arith.constant 0.353553385 : f32
    %64 = vector.broadcast %cst_23 : f32 to vector<8x8x8xf32>
    %65 = arith.mulf %63, %64 : vector<8x8x8xf32>
    %66 = tpu.iota {dimensions = array<i32: 0>} : vector<8x8xi32>
    %67 = tpu.iota {dimensions = array<i32: 1>} : vector<8x8xi32>
    %68 = arith.cmpi sge, %66, %67 : vector<8x8xi32>
    %69 = vector.shape_cast %68 : vector<8x8xi1> to vector<1x8x8xi1>
    %cst_24 = arith.constant -1.000000e+09 : f32
    %70 = vector.shape_cast %69 : vector<1x8x8xi1> to vector<1x8x8xi1>
    %71 = vector.broadcast %70 : vector<1x8x8xi1> to vector<8x8x8xi1>
    %72 = vector.broadcast %cst_24 : f32 to vector<8x8x8xf32>
    %73 = arith.select %71, %65, %72 : vector<8x8x8xi1>, vector<8x8x8xf32>
    %cst_25 = arith.constant dense<0xFF800000> : vector<8x8xf32>
    %74 = vector.multi_reduction <maximumf>, %73, %cst_25 [2] : vector<8x8x8xf32> to vector<8x8xf32>
    %75 = vector.shape_cast %74 : vector<8x8xf32> to vector<8x8x1xf32>
    %76 = vector.broadcast %75 : vector<8x8x1xf32> to vector<8x8x8xf32>
    %77 = arith.subf %73, %76 : vector<8x8x8xf32>
    %78 = math.exp %77 : vector<8x8x8xf32>
    %cst_26 = arith.constant dense<0.000000e+00> : vector<8x8xf32>
    %79 = vector.multi_reduction <add>, %78, %cst_26 [2] : vector<8x8x8xf32> to vector<8x8xf32>
    %80 = vector.shape_cast %79 : vector<8x8xf32> to vector<8x8x1xf32>
    %81 = tpu.reciprocal %80 {approx = true} : vector<8x8x1xf32> -> vector<8x8x1xf32>
    %82 = vector.broadcast %81 : vector<8x8x1xf32> to vector<8x8x8xf32>
    %83 = arith.mulf %78, %82 : vector<8x8x8xf32>
    "tpu.trace_start"() <{level = 10 : i32, message = "bqk,bkd->bqd"}> : () -> ()
    %cst_27 = arith.constant dense<0.000000e+00> : vector<8x8x8xf32>
    %84 = tpu.matmul %83, %62, %cst_27 {dimension_numbers = #tpu.dot_dimension_numbers<[2], [1], [1], [2], [0, 0, 0, 1, 1, 2], [0], [0]>} : vector<8x8x8xf32>, vector<8x8x8xf32>, vector<8x8x8xf32> -> vector<8x8x8xf32>
    "tpu.trace_stop"() : () -> ()
    %85 = vector.extract_strided_slice %84 {offsets = [0, 0, 0], sizes = [2, 8, 8], strides = [1, 1, 1]} : vector<8x8x8xf32> to vector<2x8x8xf32>
    %86 = vector.shape_cast %85 : vector<2x8x8xf32> to vector<16x8xf32>
    %c0_28 = arith.constant 0 : index
    %c96 = arith.constant 96 : index
    %87 = vector.load %arg2[%c0_28, %c96] : memref<32x320xf32, #tpu.memory_space<vmem>>, vector<8x32xf32>
    %cst_29 = arith.constant dense<0.000000e+00> : vector<16x32xf32>
    %88 = tpu.matmul %86, %87, %cst_29 {dimension_numbers = #tpu.dot_dimension_numbers<[1], [0], [0], [1], [0, 0, 1, 1], [], []>} : vector<16x8xf32>, vector<8x32xf32>, vector<16x32xf32> -> vector<16x32xf32>
    %89 = vector.extract_strided_slice %84 {offsets = [2, 0, 0], sizes = [2, 8, 8], strides = [1, 1, 1]} : vector<8x8x8xf32> to vector<2x8x8xf32>
    %90 = vector.shape_cast %89 : vector<2x8x8xf32> to vector<16x8xf32>
    %c8_30 = arith.constant 8 : index
    %c96_31 = arith.constant 96 : index
    %91 = vector.load %arg2[%c8_30, %c96_31] : memref<32x320xf32, #tpu.memory_space<vmem>>, vector<8x32xf32>
    %cst_32 = arith.constant dense<0.000000e+00> : vector<16x32xf32>
    %92 = tpu.matmul %90, %91, %cst_32 {dimension_numbers = #tpu.dot_dimension_numbers<[1], [0], [0], [1], [0, 0, 1, 1], [], []>} : vector<16x8xf32>, vector<8x32xf32>, vector<16x32xf32> -> vector<16x32xf32>
    %93 = arith.addf %88, %92 : vector<16x32xf32>
    %94 = vector.extract_strided_slice %84 {offsets = [4, 0, 0], sizes = [2, 8, 8], strides = [1, 1, 1]} : vector<8x8x8xf32> to vector<2x8x8xf32>
    %95 = vector.shape_cast %94 : vector<2x8x8xf32> to vector<16x8xf32>
    %c16 = arith.constant 16 : index
    %c96_33 = arith.constant 96 : index
    %96 = vector.load %arg2[%c16, %c96_33] : memref<32x320xf32, #tpu.memory_space<vmem>>, vector<8x32xf32>
    %cst_34 = arith.constant dense<0.000000e+00> : vector<16x32xf32>
    %97 = tpu.matmul %95, %96, %cst_34 {dimension_numbers = #tpu.dot_dimension_numbers<[1], [0], [0], [1], [0, 0, 1, 1], [], []>} : vector<16x8xf32>, vector<8x32xf32>, vector<16x32xf32> -> vector<16x32xf32>
    %98 = arith.addf %93, %97 : vector<16x32xf32>
    %99 = vector.extract_strided_slice %84 {offsets = [6, 0, 0], sizes = [2, 8, 8], strides = [1, 1, 1]} : vector<8x8x8xf32> to vector<2x8x8xf32>
    %100 = vector.shape_cast %99 : vector<2x8x8xf32> to vector<16x8xf32>
    %c24 = arith.constant 24 : index
    %c96_35 = arith.constant 96 : index
    %101 = vector.load %arg2[%c24, %c96_35] : memref<32x320xf32, #tpu.memory_space<vmem>>, vector<8x32xf32>
    %cst_36 = arith.constant dense<0.000000e+00> : vector<16x32xf32>
    %102 = tpu.matmul %100, %101, %cst_36 {dimension_numbers = #tpu.dot_dimension_numbers<[1], [0], [0], [1], [0, 0, 1, 1], [], []>} : vector<16x8xf32>, vector<8x32xf32>, vector<16x32xf32> -> vector<16x32xf32>
    %103 = arith.addf %98, %102 : vector<16x32xf32>
    %c9 = arith.constant 9 : index
    %c0_37 = arith.constant 0 : index
    %104 = vector.load %arg3[%c9, %c0_37] : memref<16x32xf32, #tpu.memory_space<vmem>>, vector<1x32xf32>
    %105 = vector.broadcast %104 : vector<1x32xf32> to vector<16x32xf32>
    %106 = arith.addf %103, %105 : vector<16x32xf32>
    %107 = vector.shape_cast %106 : vector<16x32xf32> to vector<2x8x32xf32>
    %108 = arith.addf %0, %107 : vector<2x8x32xf32>
    %c2 = arith.constant 2 : index
    %c0_38 = arith.constant 0 : index
    %109 = vector.load %arg3[%c2, %c0_38] : memref<16x32xf32, #tpu.memory_space<vmem>>, vector<1x32xf32>
    %c3 = arith.constant 3 : index
    %c0_39 = arith.constant 0 : index
    %110 = vector.load %arg3[%c3, %c0_39] : memref<16x32xf32, #tpu.memory_space<vmem>>, vector<1x32xf32>
    %cst_40 = arith.constant dense<0.000000e+00> : vector<2x8xf32>
    %111 = vector.multi_reduction <add>, %108, %cst_40 [2] : vector<2x8x32xf32> to vector<2x8xf32>
    %112 = vector.shape_cast %111 : vector<2x8xf32> to vector<2x8x1xf32>
    %cst_41 = arith.constant 3.200000e+01 : f32
    %113 = vector.broadcast %cst_41 : f32 to vector<2x8x1xf32>
    %114 = arith.divf %112, %113 : vector<2x8x1xf32>
    %115 = vector.broadcast %114 : vector<2x8x1xf32> to vector<2x8x32xf32>
    %116 = arith.subf %108, %115 : vector<2x8x32xf32>
    %117 = arith.mulf %116, %116 : vector<2x8x32xf32>
    %cst_42 = arith.constant dense<0.000000e+00> : vector<2x8xf32>
    %118 = vector.multi_reduction <add>, %117, %cst_42 [2] : vector<2x8x32xf32> to vector<2x8xf32>
    %119 = vector.shape_cast %118 : vector<2x8xf32> to vector<2x8x1xf32>
    %cst_43 = arith.constant 3.200000e+01 : f32
    %120 = vector.broadcast %cst_43 : f32 to vector<2x8x1xf32>
    %121 = arith.divf %119, %120 : vector<2x8x1xf32>
    %122 = vector.broadcast %114 : vector<2x8x1xf32> to vector<2x8x32xf32>
    %123 = arith.subf %108, %122 : vector<2x8x32xf32>
    %cst_44 = arith.constant 9.99999997E-7 : f32
    %124 = vector.broadcast %cst_44 : f32 to vector<2x8x1xf32>
    %125 = arith.addf %121, %124 : vector<2x8x1xf32>
    %126 = math.rsqrt %125 : vector<2x8x1xf32>
    %127 = vector.broadcast %126 : vector<2x8x1xf32> to vector<2x8x32xf32>
    %128 = arith.mulf %123, %127 : vector<2x8x32xf32>
    %129 = vector.shape_cast %109 : vector<1x32xf32> to vector<1x1x32xf32>
    %130 = vector.broadcast %129 : vector<1x1x32xf32> to vector<2x8x32xf32>
    %131 = arith.mulf %128, %130 : vector<2x8x32xf32>
    %132 = vector.shape_cast %110 : vector<1x32xf32> to vector<1x1x32xf32>
    %133 = vector.broadcast %132 : vector<1x1x32xf32> to vector<2x8x32xf32>
    %134 = arith.addf %131, %133 : vector<2x8x32xf32>
    %135 = vector.shape_cast %134 : vector<2x8x32xf32> to vector<16x32xf32>
    %136 = vector.shape_cast %1 : vector<2x8x32xf32> to vector<16x32xf32>
    %c0_45 = arith.constant 0 : index
    %c128 = arith.constant 128 : index
    %137 = vector.load %arg2[%c0_45, %c128] : memref<32x320xf32, #tpu.memory_space<vmem>>, vector<32x32xf32>
    %cst_46 = arith.constant dense<0.000000e+00> : vector<16x32xf32>
    %138 = tpu.matmul %135, %137, %cst_46 {dimension_numbers = #tpu.dot_dimension_numbers<[1], [0], [0], [1], [0, 0, 1, 1], [], []>} : vector<16x32xf32>, vector<32x32xf32>, vector<16x32xf32> -> vector<16x32xf32>
    %c10 = arith.constant 10 : index
    %c0_47 = arith.constant 0 : index
    %139 = vector.load %arg3[%c10, %c0_47] : memref<16x32xf32, #tpu.memory_space<vmem>>, vector<1x32xf32>
    %140 = vector.broadcast %139 : vector<1x32xf32> to vector<16x32xf32>
    %141 = arith.addf %138, %140 : vector<16x32xf32>
    %142 = vector.shape_cast %141 : vector<16x32xf32> to vector<2x8x32xf32>
    %c0_48 = arith.constant 0 : index
    %c160 = arith.constant 160 : index
    %143 = vector.load %arg2[%c0_48, %c160] : memref<32x320xf32, #tpu.memory_space<vmem>>, vector<32x32xf32>
    %cst_49 = arith.constant dense<0.000000e+00> : vector<16x32xf32>
    %144 = tpu.matmul %136, %143, %cst_49 {dimension_numbers = #tpu.dot_dimension_numbers<[1], [0], [0], [1], [0, 0, 1, 1], [], []>} : vector<16x32xf32>, vector<32x32xf32>, vector<16x32xf32> -> vector<16x32xf32>
    %c11 = arith.constant 11 : index
    %c0_50 = arith.constant 0 : index
    %145 = vector.load %arg3[%c11, %c0_50] : memref<16x32xf32, #tpu.memory_space<vmem>>, vector<1x32xf32>
    %146 = vector.broadcast %145 : vector<1x32xf32> to vector<16x32xf32>
    %147 = arith.addf %144, %146 : vector<16x32xf32>
    %148 = vector.shape_cast %147 : vector<16x32xf32> to vector<2x8x32xf32>
    %c0_51 = arith.constant 0 : index
    %c192 = arith.constant 192 : index
    %149 = vector.load %arg2[%c0_51, %c192] : memref<32x320xf32, #tpu.memory_space<vmem>>, vector<32x32xf32>
    %cst_52 = arith.constant dense<0.000000e+00> : vector<16x32xf32>
    %150 = tpu.matmul %136, %149, %cst_52 {dimension_numbers = #tpu.dot_dimension_numbers<[1], [0], [0], [1], [0, 0, 1, 1], [], []>} : vector<16x32xf32>, vector<32x32xf32>, vector<16x32xf32> -> vector<16x32xf32>
    %c12 = arith.constant 12 : index
    %c0_53 = arith.constant 0 : index
    %151 = vector.load %arg3[%c12, %c0_53] : memref<16x32xf32, #tpu.memory_space<vmem>>, vector<1x32xf32>
    %152 = vector.broadcast %151 : vector<1x32xf32> to vector<16x32xf32>
    %153 = arith.addf %150, %152 : vector<16x32xf32>
    %154 = vector.shape_cast %153 : vector<16x32xf32> to vector<2x8x32xf32>
    %155 = vector.extract_strided_slice %142 {offsets = [0, 0, 0], sizes = [2, 8, 8], strides = [1, 1, 1]} : vector<2x8x32xf32> to vector<2x8x8xf32>
    %156 = vector.extract_strided_slice %142 {offsets = [0, 0, 8], sizes = [2, 8, 8], strides = [1, 1, 1]} : vector<2x8x32xf32> to vector<2x8x8xf32>
    %157 = vector.extract_strided_slice %142 {offsets = [0, 0, 16], sizes = [2, 8, 8], strides = [1, 1, 1]} : vector<2x8x32xf32> to vector<2x8x8xf32>
    %158 = vector.extract_strided_slice %142 {offsets = [0, 0, 24], sizes = [2, 8, 8], strides = [1, 1, 1]} : vector<2x8x32xf32> to vector<2x8x8xf32>
    %159 = tpu.concatenate %155, %156, %157, %158 in 0 : vector<2x8x8xf32>, vector<2x8x8xf32>, vector<2x8x8xf32>, vector<2x8x8xf32> -> vector<8x8x8xf32>
    %160 = vector.extract_strided_slice %148 {offsets = [0, 0, 0], sizes = [2, 8, 8], strides = [1, 1, 1]} : vector<2x8x32xf32> to vector<2x8x8xf32>
    %161 = vector.extract_strided_slice %148 {offsets = [0, 0, 8], sizes = [2, 8, 8], strides = [1, 1, 1]} : vector<2x8x32xf32> to vector<2x8x8xf32>
    %162 = vector.extract_strided_slice %148 {offsets = [0, 0, 16], sizes = [2, 8, 8], strides = [1, 1, 1]} : vector<2x8x32xf32> to vector<2x8x8xf32>
    %163 = vector.extract_strided_slice %148 {offsets = [0, 0, 24], sizes = [2, 8, 8], strides = [1, 1, 1]} : vector<2x8x32xf32> to vector<2x8x8xf32>
    %164 = tpu.concatenate %160, %161, %162, %163 in 0 : vector<2x8x8xf32>, vector<2x8x8xf32>, vector<2x8x8xf32>, vector<2x8x8xf32> -> vector<8x8x8xf32>
    %165 = vector.extract_strided_slice %154 {offsets = [0, 0, 0], sizes = [2, 8, 8], strides = [1, 1, 1]} : vector<2x8x32xf32> to vector<2x8x8xf32>
    %166 = vector.extract_strided_slice %154 {offsets = [0, 0, 8], sizes = [2, 8, 8], strides = [1, 1, 1]} : vector<2x8x32xf32> to vector<2x8x8xf32>
    %167 = vector.extract_strided_slice %154 {offsets = [0, 0, 16], sizes = [2, 8, 8], strides = [1, 1, 1]} : vector<2x8x32xf32> to vector<2x8x8xf32>
    %168 = vector.extract_strided_slice %154 {offsets = [0, 0, 24], sizes = [2, 8, 8], strides = [1, 1, 1]} : vector<2x8x32xf32> to vector<2x8x8xf32>
    %169 = tpu.concatenate %165, %166, %167, %168 in 0 : vector<2x8x8xf32>, vector<2x8x8xf32>, vector<2x8x8xf32>, vector<2x8x8xf32> -> vector<8x8x8xf32>
    "tpu.trace_start"() <{level = 10 : i32, message = "bqd,bkd->bqk"}> : () -> ()
    %cst_54 = arith.constant dense<0.000000e+00> : vector<8x8x8xf32>
    %170 = tpu.matmul %159, %164, %cst_54 {dimension_numbers = #tpu.dot_dimension_numbers<[2], [2], [1], [1], [0, 0, 0, 1, 1, 1], [0], [0]>} : vector<8x8x8xf32>, vector<8x8x8xf32>, vector<8x8x8xf32> -> vector<8x8x8xf32>
    "tpu.trace_stop"() : () -> ()
    %cst_55 = arith.constant 0.353553385 : f32
    %171 = vector.broadcast %cst_55 : f32 to vector<8x8x8xf32>
    %172 = arith.mulf %170, %171 : vector<8x8x8xf32>
    %cst_56 = arith.constant dense<0xFF800000> : vector<8x8xf32>
    %173 = vector.multi_reduction <maximumf>, %172, %cst_56 [2] : vector<8x8x8xf32> to vector<8x8xf32>
    %174 = vector.shape_cast %173 : vector<8x8xf32> to vector<8x8x1xf32>
    %175 = vector.broadcast %174 : vector<8x8x1xf32> to vector<8x8x8xf32>
    %176 = arith.subf %172, %175 : vector<8x8x8xf32>
    %177 = math.exp %176 : vector<8x8x8xf32>
    %cst_57 = arith.constant dense<0.000000e+00> : vector<8x8xf32>
    %178 = vector.multi_reduction <add>, %177, %cst_57 [2] : vector<8x8x8xf32> to vector<8x8xf32>
    %179 = vector.shape_cast %178 : vector<8x8xf32> to vector<8x8x1xf32>
    %180 = tpu.reciprocal %179 {approx = true} : vector<8x8x1xf32> -> vector<8x8x1xf32>
    %181 = vector.broadcast %180 : vector<8x8x1xf32> to vector<8x8x8xf32>
    %182 = arith.mulf %177, %181 : vector<8x8x8xf32>
    "tpu.trace_start"() <{level = 10 : i32, message = "bqk,bkd->bqd"}> : () -> ()
    %cst_58 = arith.constant dense<0.000000e+00> : vector<8x8x8xf32>
    %183 = tpu.matmul %182, %169, %cst_58 {dimension_numbers = #tpu.dot_dimension_numbers<[2], [1], [1], [2], [0, 0, 0, 1, 1, 2], [0], [0]>} : vector<8x8x8xf32>, vector<8x8x8xf32>, vector<8x8x8xf32> -> vector<8x8x8xf32>
    "tpu.trace_stop"() : () -> ()
    %184 = vector.extract_strided_slice %183 {offsets = [0, 0, 0], sizes = [2, 8, 8], strides = [1, 1, 1]} : vector<8x8x8xf32> to vector<2x8x8xf32>
    %185 = vector.shape_cast %184 : vector<2x8x8xf32> to vector<16x8xf32>
    %c0_59 = arith.constant 0 : index
    %c224 = arith.constant 224 : index
    %186 = vector.load %arg2[%c0_59, %c224] : memref<32x320xf32, #tpu.memory_space<vmem>>, vector<8x32xf32>
    %cst_60 = arith.constant dense<0.000000e+00> : vector<16x32xf32>
    %187 = tpu.matmul %185, %186, %cst_60 {dimension_numbers = #tpu.dot_dimension_numbers<[1], [0], [0], [1], [0, 0, 1, 1], [], []>} : vector<16x8xf32>, vector<8x32xf32>, vector<16x32xf32> -> vector<16x32xf32>
    %188 = vector.extract_strided_slice %183 {offsets = [2, 0, 0], sizes = [2, 8, 8], strides = [1, 1, 1]} : vector<8x8x8xf32> to vector<2x8x8xf32>
    %189 = vector.shape_cast %188 : vector<2x8x8xf32> to vector<16x8xf32>
    %c8_61 = arith.constant 8 : index
    %c224_62 = arith.constant 224 : index
    %190 = vector.load %arg2[%c8_61, %c224_62] : memref<32x320xf32, #tpu.memory_space<vmem>>, vector<8x32xf32>
    %cst_63 = arith.constant dense<0.000000e+00> : vector<16x32xf32>
    %191 = tpu.matmul %189, %190, %cst_63 {dimension_numbers = #tpu.dot_dimension_numbers<[1], [0], [0], [1], [0, 0, 1, 1], [], []>} : vector<16x8xf32>, vector<8x32xf32>, vector<16x32xf32> -> vector<16x32xf32>
    %192 = arith.addf %187, %191 : vector<16x32xf32>
    %193 = vector.extract_strided_slice %183 {offsets = [4, 0, 0], sizes = [2, 8, 8], strides = [1, 1, 1]} : vector<8x8x8xf32> to vector<2x8x8xf32>
    %194 = vector.shape_cast %193 : vector<2x8x8xf32> to vector<16x8xf32>
    %c16_64 = arith.constant 16 : index
    %c224_65 = arith.constant 224 : index
    %195 = vector.load %arg2[%c16_64, %c224_65] : memref<32x320xf32, #tpu.memory_space<vmem>>, vector<8x32xf32>
    %cst_66 = arith.constant dense<0.000000e+00> : vector<16x32xf32>
    %196 = tpu.matmul %194, %195, %cst_66 {dimension_numbers = #tpu.dot_dimension_numbers<[1], [0], [0], [1], [0, 0, 1, 1], [], []>} : vector<16x8xf32>, vector<8x32xf32>, vector<16x32xf32> -> vector<16x32xf32>
    %197 = arith.addf %192, %196 : vector<16x32xf32>
    %198 = vector.extract_strided_slice %183 {offsets = [6, 0, 0], sizes = [2, 8, 8], strides = [1, 1, 1]} : vector<8x8x8xf32> to vector<2x8x8xf32>
    %199 = vector.shape_cast %198 : vector<2x8x8xf32> to vector<16x8xf32>
    %c24_67 = arith.constant 24 : index
    %c224_68 = arith.constant 224 : index
    %200 = vector.load %arg2[%c24_67, %c224_68] : memref<32x320xf32, #tpu.memory_space<vmem>>, vector<8x32xf32>
    %cst_69 = arith.constant dense<0.000000e+00> : vector<16x32xf32>
    %201 = tpu.matmul %199, %200, %cst_69 {dimension_numbers = #tpu.dot_dimension_numbers<[1], [0], [0], [1], [0, 0, 1, 1], [], []>} : vector<16x8xf32>, vector<8x32xf32>, vector<16x32xf32> -> vector<16x32xf32>
    %202 = arith.addf %197, %201 : vector<16x32xf32>
    %c13 = arith.constant 13 : index
    %c0_70 = arith.constant 0 : index
    %203 = vector.load %arg3[%c13, %c0_70] : memref<16x32xf32, #tpu.memory_space<vmem>>, vector<1x32xf32>
    %204 = vector.broadcast %203 : vector<1x32xf32> to vector<16x32xf32>
    %205 = arith.addf %202, %204 : vector<16x32xf32>
    %206 = vector.shape_cast %205 : vector<16x32xf32> to vector<2x8x32xf32>
    %207 = arith.addf %108, %206 : vector<2x8x32xf32>
    %c4 = arith.constant 4 : index
    %c0_71 = arith.constant 0 : index
    %208 = vector.load %arg3[%c4, %c0_71] : memref<16x32xf32, #tpu.memory_space<vmem>>, vector<1x32xf32>
    %c5 = arith.constant 5 : index
    %c0_72 = arith.constant 0 : index
    %209 = vector.load %arg3[%c5, %c0_72] : memref<16x32xf32, #tpu.memory_space<vmem>>, vector<1x32xf32>
    %cst_73 = arith.constant dense<0.000000e+00> : vector<2x8xf32>
    %210 = vector.multi_reduction <add>, %207, %cst_73 [2] : vector<2x8x32xf32> to vector<2x8xf32>
    %211 = vector.shape_cast %210 : vector<2x8xf32> to vector<2x8x1xf32>
    %cst_74 = arith.constant 3.200000e+01 : f32
    %212 = vector.broadcast %cst_74 : f32 to vector<2x8x1xf32>
    %213 = arith.divf %211, %212 : vector<2x8x1xf32>
    %214 = vector.broadcast %213 : vector<2x8x1xf32> to vector<2x8x32xf32>
    %215 = arith.subf %207, %214 : vector<2x8x32xf32>
    %216 = arith.mulf %215, %215 : vector<2x8x32xf32>
    %cst_75 = arith.constant dense<0.000000e+00> : vector<2x8xf32>
    %217 = vector.multi_reduction <add>, %216, %cst_75 [2] : vector<2x8x32xf32> to vector<2x8xf32>
    %218 = vector.shape_cast %217 : vector<2x8xf32> to vector<2x8x1xf32>
    %cst_76 = arith.constant 3.200000e+01 : f32
    %219 = vector.broadcast %cst_76 : f32 to vector<2x8x1xf32>
    %220 = arith.divf %218, %219 : vector<2x8x1xf32>
    %221 = vector.broadcast %213 : vector<2x8x1xf32> to vector<2x8x32xf32>
    %222 = arith.subf %207, %221 : vector<2x8x32xf32>
    %cst_77 = arith.constant 9.99999997E-7 : f32
    %223 = vector.broadcast %cst_77 : f32 to vector<2x8x1xf32>
    %224 = arith.addf %220, %223 : vector<2x8x1xf32>
    %225 = math.rsqrt %224 : vector<2x8x1xf32>
    %226 = vector.broadcast %225 : vector<2x8x1xf32> to vector<2x8x32xf32>
    %227 = arith.mulf %222, %226 : vector<2x8x32xf32>
    %228 = vector.shape_cast %208 : vector<1x32xf32> to vector<1x1x32xf32>
    %229 = vector.broadcast %228 : vector<1x1x32xf32> to vector<2x8x32xf32>
    %230 = arith.mulf %227, %229 : vector<2x8x32xf32>
    %231 = vector.shape_cast %209 : vector<1x32xf32> to vector<1x1x32xf32>
    %232 = vector.broadcast %231 : vector<1x1x32xf32> to vector<2x8x32xf32>
    %233 = arith.addf %230, %232 : vector<2x8x32xf32>
    %234 = vector.shape_cast %233 : vector<2x8x32xf32> to vector<16x32xf32>
    %c0_78 = arith.constant 0 : index
    %c256 = arith.constant 256 : index
    %235 = vector.load %arg2[%c0_78, %c256] : memref<32x320xf32, #tpu.memory_space<vmem>>, vector<32x32xf32>
    %cst_79 = arith.constant dense<0.000000e+00> : vector<16x32xf32>
    %236 = tpu.matmul %234, %235, %cst_79 {dimension_numbers = #tpu.dot_dimension_numbers<[1], [0], [0], [1], [0, 0, 1, 1], [], []>} : vector<16x32xf32>, vector<32x32xf32>, vector<16x32xf32> -> vector<16x32xf32>
    %c14 = arith.constant 14 : index
    %c0_80 = arith.constant 0 : index
    %237 = vector.load %arg3[%c14, %c0_80] : memref<16x32xf32, #tpu.memory_space<vmem>>, vector<1x32xf32>
    %238 = vector.broadcast %237 : vector<1x32xf32> to vector<16x32xf32>
    %239 = arith.addf %236, %238 : vector<16x32xf32>
    %cst_81 = arith.constant 0.000000e+00 : f32
    %240 = vector.broadcast %cst_81 : f32 to vector<16x32xf32>
    %241 = arith.maximumf %239, %240 : vector<16x32xf32>
    %c0_82 = arith.constant 0 : index
    %c288 = arith.constant 288 : index
    %242 = vector.load %arg2[%c0_82, %c288] : memref<32x320xf32, #tpu.memory_space<vmem>>, vector<32x32xf32>
    %cst_83 = arith.constant dense<0.000000e+00> : vector<16x32xf32>
    %243 = tpu.matmul %241, %242, %cst_83 {dimension_numbers = #tpu.dot_dimension_numbers<[1], [0], [0], [1], [0, 0, 1, 1], [], []>} : vector<16x32xf32>, vector<32x32xf32>, vector<16x32xf32> -> vector<16x32xf32>
    %c15 = arith.constant 15 : index
    %c0_84 = arith.constant 0 : index
    %244 = vector.load %arg3[%c15, %c0_84] : memref<16x32xf32, #tpu.memory_space<vmem>>, vector<1x32xf32>
    %245 = vector.broadcast %244 : vector<1x32xf32> to vector<16x32xf32>
    %246 = arith.addf %243, %245 : vector<16x32xf32>
    %247 = vector.shape_cast %246 : vector<16x32xf32> to vector<2x8x32xf32>
    %248 = arith.addf %207, %247 : vector<2x8x32xf32>
    %c0_85 = arith.constant 0 : index
    %c0_86 = arith.constant 0 : index
    %c0_87 = arith.constant 0 : index
    %249 = vector.load %arg4[%c0_85, %c0_86, %c0_87] : memref<2x8x32xf32, #tpu.memory_space<vmem>>, vector<2x8x32xf32>
    tpu.vector_store %arg4[%c0_85, %c0_86, %c0_87], %248 {strides = array<i32>} : memref<2x8x32xf32, #tpu.memory_space<vmem>>, vector<2x8x32xf32>,
    return
  }
}

</mosaic_0001>

<bundles_post_ra>
// kernel: tpu_custom_call.1
= control target key start
LH: loop header
LB: loop body
LE: loop exit
PB: predicated region body
PF: predicated region fallthrough
CT: control target
= control target key end

     0   :  { %9 = vsyncpa [#allocation3], 0  ;;  %s5687_s0 = inlined_call_operand.hbm [shape: f32[2,8,32], index: 0, kind: input, shape index: {}, may-alias: {0,4}]   ;;  %s5688_s1 = inlined_call_operand.vmem [shape: f32[2,8,32], index: 1, kind: input, shape index: {}]   ;;  %s5689_s2 = inlined_call_operand.hbm [shape: f32[32,320], index: 2, kind: input, shape index: {}]   ;;  %s5690_s3 = inlined_call_operand.vmem [shape: f32[16,32], index: 3, kind: input, shape index: {}]   ;;  %s5691_s4 = inlined_call_operand.hbm [shape: f32[2,8,32], index: 4, kind: output, shape index: {}, may-alias: {0,4}]  }
   0x1   :  { %10 = vsyncpa [#allocation6], 0 }
   0x2   :  { %11 = vsyncpa [#allocation4], 0  ;;  %s5129_s15 = smov [#allocation2]   ;;  %s5057_s19 = scalar_lea.hbm %s5687_s0, 256 }
   0x3   :  { %s17_s16 = sshll.u32 %s5129_s15, 4  ;;  %p5058_p0 = scmp.ne.s32.totalorder %s5687_s0, %s5057_s19  ;;  %s18_s16 = int_to_ptr.vmem [resolvable:$true] %s17_s16 }
   0x4   :  { %p5061_p1 = scmp.lt.u32.totalorder %s5057_s19, %s5687_s0 }
   0x6   :  { %p5063_p2 = pnand %p5061_p1, %p5058_p0 }
   0x8   :  { %5066 = shalt.err (!%p5063_p2)
}
   0x9   :  { %s5067_s24 = scalar_lea.vmem %s18_s16, 256  ;;  %p5072_p4 = scmp.lt.s32.totalorder %s18_s16, %s18_s16 }
   0xa   :  { %p5068_p3 = scmp.ne.s32.totalorder %s18_s16, %s5067_s24  ;;  %p5073_p5 = scmp.lt.s32.totalorder %s5067_s24, %s5067_s24 }
   0xc   :  { %p5074_p6 = por %p5073_p5, %p5072_p4 }
   0xe   :  { %p5075_p7 = pnand %p5074_p6, %p5068_p3 }
  0x10   :  { %5078 = shalt.err (!%p5075_p7)
}
  0x11   :  { %s5130_s25 = smov 128   ;;  %s5131_s26 = smov 8  }
  0x12   :  { %23 = dma.hbm_to_vmem [thread:$0]  %s5687_s0, 256, %s18_s16, [#allocation3], %s5130_s25, %s5130_s25, %s5131_s26  }
  0x13   :  { %s5132_s29 = smov [#allocation5]   ;;  %s5079_s7 = scalar_lea.hbm %s5689_s2, 1536 }
  0x14   :  { %s31_s30 = sshll.u32 %s5132_s29, 4  ;;  %p5080_p8 = scmp.ne.s32.totalorder %s5689_s2, %s5079_s7  ;;  %s32_s30 = int_to_ptr.vmem [resolvable:$true] %s31_s30 }
  0x15   :  { %p5083_p9 = scmp.lt.u32.totalorder %s5079_s7, %s5689_s2 }
  0x17   :  { %p5085_p10 = pnand %p5083_p9, %p5080_p8 }
  0x19   :  { %5088 = shalt.err (!%p5085_p10)
}
  0x1a   :  { %s5089_s12 = scalar_lea.vmem %s32_s30, 1536  ;;  %p5094_p12 = scmp.lt.s32.totalorder %s32_s30, %s32_s30 }
  0x1b   :  { %p5090_p11 = scmp.ne.s32.totalorder %s32_s30, %s5089_s12  ;;  %p5095_p13 = scmp.lt.s32.totalorder %s5089_s12, %s5089_s12 }
  0x1d   :  { %p5096_p0 = por %p5095_p13, %p5094_p12 }
  0x1f   :  { %p5097_p1 = pnand %p5096_p0, %p5090_p11 }
  0x21   :  { %5100 = shalt.err (!%p5097_p1)
}
  0x22   :  { %s5133_s0 = smov 384   ;;  %s5134_s13 = smov 24  }
  0x23   :  { %37 = dma.hbm_to_vmem [thread:$0]  %s5689_s2, 1536, %s32_s30, [#allocation6], %s5133_s0, %s5133_s0, %s5134_s13  }
  0x24   :  { %5123 = dma.done.wait [#allocation3], 256  }
  0x25   :  { %5124 = vsyncadd [#allocation3], 4294967040 }
  0x26   :  { %5125 = dma.done.wait [#allocation6], 1536  }
  0x27   :  { %5126 = vsyncadd [#allocation6], 4294965760  ;;  %vm52_vm0 = vcmask 261120   ;;  %v5196_v0 = vld [vmem:[#allocation2] sm:$0xff]  ;;  %v5198_v1 = vld [vmem:[#allocation2 + $0x8] sm:$0xff]  ;;  %s5135_s2 = smov 96  }
  0x28   :  { %v53_v2 = vsel %vm52_vm0, %v5196_v0, 0.0  ;;  %v56_v3 = vsel %vm52_vm0, %v5198_v1, 0.0  ;;  %v5204_v4 = vld [vmem:[#allocation5] sm:$0xff]  ;;  %v5206_v5 = vld [vmem:[#allocation5 + $0x18] sm:$0xff]  ;;  %v5215_v17 = vld [vmem:[#allocation5 + $0x30] sm:$0xff]  ;;  %s5136_s16 = smov 64  }
  0x29   :  { %54 = vadd.xlane.f32.xlu0 %v53_v2  ;;  %v4931_v6 = vpack.i.bf16 %v5206_v5, %v5204_v4  ;;  %v5217_v18 = vld [vmem:[#allocation5 + $0x48] sm:$0xff]  ;;  %v4840_v23 = vpack.c.bf16 %v5206_v5, %v5204_v4  ;;  %v4320_v41 = vld [vmem:[%s5690_s3] ss:$0 sm:$0xff]  ;;  %v4321_v43 = vld [vmem:[%s5690_s3 + $0x1] ss:$0 sm:$0xff]  ;;  %v5137_v54 = vmov 0.0  }
  0x2a   :  { %v4936_v19 = vpack.i.bf16 %v5217_v18, %v5215_v17  ;;  %v4844_v25 = vpack.c.bf16 %v5217_v18, %v5215_v17  ;;  %vm5138_vm1 = vmmov 0   ;;  %v4325_v55 = vld [vmem:[%s5690_s3 + $0x7] ss:$0 sm:$0xff]  ;;  %vm418_vm2 = vcmask 64512   ;;  %v4322_v61 = vld [vmem:[%s5690_s3 + $0x6] ss:$0 sm:$0xff] }
  0x2b   :  { %4841 = vmatprep.subr.bf16.mxu0 %v4840_v23  ;;  %s5139_s27 = smov 120   ;;  %s5140_s28 = smov 112  }
  0x2c   :  { %4843 = vmatpush3.bf16.msra.mxu0 %v4840_v23  ;;  %s5141_s29 = smov 104   ;;  %s5142_s6 = smov 32  }
  0x2d   :  { %57 = vadd.xlane.f32.xlu0 %v56_v3  ;;  %4845 = vmatprep.subr.bf16.mxu0 %v4844_v25 }
  0x30   :  { %4847 = vmatpush3.bf16.msra.mxu0 %v4844_v25 }
  0x43   :  { %4932 = vrot.lane.b32.xlu0 %v4931_v6, %s5135_s2 }
  0xb6   :  { %v55_v7 = vpop.xlane.xlu0 %54 }
  0xb7   :  { %v60_v8 = vmul.f32 0.03125, %v55_v7 }
  0xb9   :  { %v62_v9 = vsub.f32 %v5196_v0, %v60_v8 }
  0xba   :  { %v58_v10 = vpop.xlane.xlu0 %57 }
  0xbb   :  { %v61_v11 = vmul.f32 0.03125, %v58_v10  ;;  %v64_v12 = vmul.f32 %v62_v9, %v62_v9 }
  0xbd   :  { %v63_v13 = vsub.f32 %v5198_v1, %v61_v11  ;;  %v66_v14 = vsel %vm52_vm0, %v64_v12, 0.0 }
  0xbe   :  { %67 = vadd.xlane.f32.xlu1 %v66_v14  ;;  %v4933_v20 = vpop.permute.xlu0 %4932 }
  0xbf   :  { %v65_v15 = vmul.f32 %v63_v13, %v63_v13  ;;  %v4935_v21 = vunpack.i.h.bf16 %v4933_v20  ;;  %v4934_v22 = vunpack.i.l.bf16 %v4933_v20 }
  0xc1   :  { %v69_v16 = vsel %vm52_vm0, %v65_v15, 0.0  ;;  %v4848_v24 = vpack.c.bf16 %v4935_v21, %v4934_v22 }
  0xc2   :  { %70 = vadd.xlane.f32.xlu1 %v69_v16  ;;  %v4328_v16 = vld [vmem:[%s5690_s3 + $0x8] ss:$0 sm:$0xff] }
  0xc3   :  { %4849 = vmatprep.subr.bf16.mxu1 %v4848_v24 }
  0xc4   :  { %4851 = vmatpush3.bf16.msra.mxu1 %v4848_v24  ;;  %v1019_v24 = vlaneseq }
  0xc6   :  { %v1020_v25 = vshrl.u32 %v1019_v24, 7 }
  0xd3   :  { %4937 = vrot.lane.b32.xlu1 %v4936_v19, %s5135_s2 }
  0xd7   :  { %4942 = vrot.lane.b32.xlu1 %v4931_v6, %s5136_s16 }
  0xdb   :  { %4947 = vrot.lane.b32.xlu1 %v4936_v19, %s5136_s16 }
 0x14b   :  { %v68_v26 = vpop.xlane.xlu1 %67 }
 0x14c   :  { %v72_v27 = vmul.f32 0.03125, %v68_v26  ;;  %v1022_v26 = vand.u32 127, %v1019_v24 }
 0x14e   :  { %v74_v28 = vadd.f32 1e-06, %v72_v27  ;;  %vm5315_vm3 = vcmp.ge.s32.totalorder %v1020_v25, %v1022_v26 }
 0x14f   :  { %v71_v29 = vpop.xlane.xlu1 %70 }
 0x150   :  { %4981 = vrsqrt.f32 %v74_v28  ;;  %v73_v30 = vmul.f32 0.03125, %v71_v29 }
 0x152   :  { %v75_v31 = vadd.f32 1e-06, %v73_v30 }
 0x153   :  { %v4938_v32 = vpop.permute.xlu1 %4937 }
 0x154   :  { %4983 = vrsqrt.f32 %v75_v31  ;;  %v4940_v33 = vunpack.i.h.bf16 %v4938_v32  ;;  %v4939_v34 = vunpack.i.l.bf16 %v4938_v32 }
 0x156   :  { %v4852_v35 = vpack.c.bf16 %v4940_v33, %v4939_v34 }
 0x157   :  { %v4943_v36 = vpop.permute.xlu1 %4942 }
 0x158   :  { %v4945_v37 = vunpack.i.h.bf16 %v4943_v36  ;;  %v4944_v38 = vunpack.i.l.bf16 %v4943_v36  ;;  %4853 = vmatprep.subr.bf16.mxu1 %v4852_v35 }
 0x159   :  { %4855 = vmatpush3.bf16.msra.mxu1 %v4852_v35 }
 0x15a   :  { %v4982_v39 = vpop.eup %4981  ;;  %v4856_v40 = vpack.c.bf16 %v4945_v37, %v4944_v38  ;;  %4585 = vmatprep.subr.mxu1 %v5137_v54 }
 0x15b   :  { %v78_v42 = vmul.f32 %v4982_v39, %v62_v9  ;;  %v4948_v44 = vpop.permute.xlu1 %4947 }
 0x15c   :  { %4857 = vmatprep.subr.bf16.mxu0 %v4856_v40  ;;  %v4950_v49 = vunpack.i.h.bf16 %v4948_v44  ;;  %v4949_v50 = vunpack.i.l.bf16 %v4948_v44 }
 0x15d   :  { %v84_v45 = vmul.f32 %v4320_v41, %v78_v42 }
 0x15e   :  { %v4984_v46 = vpop.eup %4983  ;;  %v4860_v53 = vpack.c.bf16 %v4950_v49, %v4949_v50 }
 0x15f   :  { %v79_v47 = vmul.f32 %v4984_v46, %v63_v13  ;;  %v90_v48 = vadd.f32 %v4321_v43, %v84_v45 }
 0x161   :  { %v85_v51 = vmul.f32 %v4320_v41, %v79_v47  ;;  %4560 = vmatprep.mubr.msk.f32.mxu0 %vm52_vm0, %v90_v48  ;;  %4571 = vmatprep.mubr.msk.f32.mxu1 %vm52_vm0, %v90_v48 }
 0x163   :  { %v91_v52 = vadd.f32 %v4321_v43, %v85_v51 }
 0x165   :  { %4561 = vmatmul.mubr.msk.f32.vlgmr.msra.gmra.mrb[0].mxu0 %vm52_vm0, %v91_v52  ;;  %4572 = vmatmul.mubr.msk.f32.vlgmr.msra.gmra.mrb[0].mxu1 %vm52_vm0, %v91_v52 }
 0x166   :  { %4859 = vmatpush3.bf16.msra.mxu0 %v4856_v40  ;;  %4582 = vmatprep.mubr.msk.f32.mxu0 %vm52_vm0, %v90_v48 }
 0x167   :  { %4861 = vmatprep.subr.bf16.mxu0 %v4860_v53  ;;  %4587 = vmatprep.mubr.msk.f32.mxu1 %vm5138_vm1, %v5137_v54 }
 0x16a   :  { %4863 = vmatpush3.bf16.msra.mxu0 %v4860_v53 }
 0x16b   :  { %4595 = vmatprep.subr.mxu0 %v5137_v54 }
 0x16d   :  { %4583 = vmatmul.mubr.msk.f32.vlgmr.msra.gmra.mrb[2].mxu0 %vm52_vm0, %v91_v52 }
 0x16e   :  { %4597 = vmatprep.mubr.msk.f32.mxu0 %vm5138_vm1, %v5137_v54 }
 0x238   :  { %v4562_v56 = vpop.f32.mrb[0].mxu0  ;;  %v4573_v57 = vpop.f32.mrb[0].mxu1 }
 0x239   :  { %v275_v58 = vadd.f32 %v4573_v57, %v4325_v55  ;;  %v173_v59 = vpop.f32.mrb[1].mxu0  ;;  %v269_v60 = vpop.f32.mrb[1].mxu1  ;;  %v179_v63 = vadd.f32 %v4562_v56, %v4322_v61 }
 0x23a   :  { %v270_v62 = vadd.f32 %v4325_v55, %v269_v60  ;;  %v174_v2 = vadd.f32 %v4322_v61, %v173_v59 }
 0x23b   :  { %388 = vrot.lane.b32.xlu1 %v275_v58, %s5139_s27 }
 0x23c   :  { %386 = vrot.lane.b32.xlu0 %v270_v62, %s5139_s27  ;;  %4586 = vmatpush3.xpose.msk.msra.mxu1 %vm418_vm2, %v270_v62 }
 0x23d   :  { %4590 = vmatprep.subr.mxu1 %v5137_v54 }
 0x23f   :  { %374 = vrot.lane.b32.xlu1 %v179_v63, %s5139_s27  ;;  %4588 = vmatmul.mubr.msk.f32.vlgmr.msra.gmra.mrb[2].mxu1 %vm418_vm2, %v174_v2 }
 0x240   :  { %v4584_v3 = vpop.f32.mrb[2].mxu0  ;;  %372 = vrot.lane.b32.xlu0 %v174_v2, %s5139_s27  ;;  %4591 = vmatpush3.xpose.msk.msra.mxu1 %vm418_vm2, %v275_v58 }
 0x241   :  { %v361_v6 = vpop.f32.mrb[3].mxu0  ;;  %4592 = vmatprep.mubr.msk.f32.mxu1 %vm5138_vm1, %v5137_v54  ;;  %4600 = vmatprep.subr.mxu1 %v5137_v54  ;;  %v5301_v20 = vadd.f32 %v4584_v3, %v4328_v16 }
 0x242   :  { %v5303_v22 = vadd.f32 %v4328_v16, %v361_v6 }
 0x243   :  { %392 = vrot.lane.b32.xlu1 %v275_v58, %s5140_s28  ;;  %4593 = vmatmul.mubr.msk.f32.vlgmr.msra.gmra.mrb[4].mxu1 %vm418_vm2, %v179_v63 }
 0x244   :  { %390 = vrot.lane.b32.xlu0 %v270_v62, %s5140_s28  ;;  %4602 = vmatprep.mubr.msk.f32.mxu1 %vm5138_vm1, %v5137_v54 }
 0x247   :  { %378 = vrot.lane.b32.xlu1 %v179_v63, %s5140_s28 }
 0x248   :  { %376 = vrot.lane.b32.xlu0 %v174_v2, %s5140_s28 }
 0x24b   :  { %396 = vrot.lane.b32.xlu1 %v275_v58, %s5141_s29 }
 0x24c   :  { %394 = vrot.lane.b32.xlu0 %v270_v62, %s5141_s29 }
 0x24f   :  { %382 = vrot.lane.b32.xlu1 %v179_v63, %s5141_s29 }
 0x250   :  { %380 = vrot.lane.b32.xlu0 %v174_v2, %s5141_s29 }
 0x2ad   :  { %v389_v7 = vpop.permute.xlu1 %388 }
 0x2ae   :  { %v387_v8 = vpop.permute.xlu0 %386  ;;  %4601 = vmatpush3.xpose.msk.msra.mxu1 %vm418_vm2, %v389_v7 }
 0x2af   :  { %4596 = vmatpush3.xpose.msk.msra.mxu0 %vm418_vm2, %v387_v8  ;;  %4610 = vmatprep.subr.mxu1 %v5137_v54 }
 0x2b0   :  { %4605 = vmatprep.subr.mxu0 %v5137_v54 }
 0x2b1   :  { %v375_v9 = vpop.permute.xlu1 %374 }
 0x2b2   :  { %v373_v10 = vpop.permute.xlu0 %372  ;;  %4603 = vmatmul.mubr.msk.f32.vlgmr.msra.gmra.mrb[6].mxu1 %vm418_vm2, %v375_v9 }
 0x2b3   :  { %4598 = vmatmul.mubr.msk.f32.vlgmr.msra.gmra.mrb[4].mxu0 %vm418_vm2, %v373_v10  ;;  %4612 = vmatprep.mubr.msk.f32.mxu1 %vm5138_vm1, %v5137_v54 }
 0x2b4   :  { %4607 = vmatprep.mubr.msk.f32.mxu0 %vm5138_vm1, %v5137_v54 }
 0x2b5   :  { %v393_v11 = vpop.permute.xlu1 %392 }
 0x2b6   :  { %v391_v12 = vpop.permute.xlu0 %390  ;;  %4611 = vmatpush3.xpose.msk.msra.mxu1 %vm418_vm2, %v393_v11 }
 0x2b7   :  { %4606 = vmatpush3.xpose.msk.msra.mxu0 %vm418_vm2, %v391_v12  ;;  %4620 = vmatprep.subr.mxu1 %v5137_v54 }
 0x2b8   :  { %4615 = vmatprep.subr.mxu0 %v5137_v54 }
 0x2b9   :  { %v379_v13 = vpop.permute.xlu1 %378 }
 0x2ba   :  { %v377_v14 = vpop.permute.xlu0 %376  ;;  %4613 = vmatmul.mubr.msk.f32.vlgmr.msra.gmra.mrb[8].mxu1 %vm418_vm2, %v379_v13 }
 0x2bb   :  { %4608 = vmatmul.mubr.msk.f32.vlgmr.msra.gmra.mrb[6].mxu0 %vm418_vm2, %v377_v14  ;;  %4622 = vmatprep.mubr.msk.f32.mxu1 %vm5138_vm1, %v5137_v54 }
 0x2bc   :  { %4617 = vmatprep.mubr.msk.f32.mxu0 %vm5138_vm1, %v5137_v54 }
 0x2bd   :  { %v397_v15 = vpop.permute.xlu1 %396 }
 0x2be   :  { %v395_v19 = vpop.permute.xlu0 %394  ;;  %4621 = vmatpush3.xpose.msk.msra.mxu1 %vm418_vm2, %v397_v15 }
 0x2bf   :  { %4616 = vmatpush3.xpose.msk.msra.mxu0 %vm418_vm2, %v395_v19  ;;  %4630 = vmatprep.subr.mxu1 %v5137_v54 }
 0x2c0   :  { %4625 = vmatprep.subr.mxu0 %v5137_v54 }
 0x2c1   :  { %v383_v21 = vpop.permute.xlu1 %382 }
 0x2c2   :  { %v381_v23 = vpop.permute.xlu0 %380  ;;  %4623 = vmatmul.mubr.msk.f32.vlgmr.msra.gmra.mrb[10].mxu1 %vm418_vm2, %v383_v21 }
 0x2c3   :  { %4631 = vmatpush3.msra.mxu1 %v5301_v20  ;;  %4618 = vmatmul.mubr.msk.f32.vlgmr.msra.gmra.mrb[8].mxu0 %vm418_vm2, %v381_v23 }
 0x2c4   :  { %4626 = vmatpush3.msra.mxu0 %v5303_v22  ;;  %4627 = vmatprep.mubr.msk.f32.mxu0 %vm5138_vm1, %v5137_v54 }
 0x2c5   :  { %4632 = vmatprep.mubr.msk.f32.mxu1 %vm5138_vm1, %v5137_v54  ;;  %4635 = vmatprep.subr.mxu0 %v5137_v54 }
 0x2c6   :  { %4640 = vmatprep.subr.mxu1 %v5137_v54 }
 0x312   :  { %v489_v27 = vpop.f32.mrb[2].mxu1 }
 0x313   :  { %v1011_v29 = vmul.f32 0.35355338, %v489_v27  ;;  %v4589_v30 = vpop.f32.mrb[3].mxu1 }
 0x315   :  { %v1026_v31 = vsel %vm5315_vm3, %v1011_v29, -1e+09 }
 0x316   :  { %v563_v32 = vpop.f32.mrb[4].mxu1  ;;  %v1034_v33 = vsel %vm418_vm2, %v1026_v31, -inf }
 0x317   :  { %v1012_v34 = vmul.f32 0.35355338, %v563_v32  ;;  %1035 = vmax.xlane.f32.xlu0 %v1034_v33  ;;  %v4594_v35 = vpop.f32.mrb[5].mxu1 }
 0x319   :  { %v1027_v36 = vsel %vm5315_vm3, %v1012_v34, -1e+09 }
 0x31a   :  { %v1037_v37 = vsel %vm418_vm2, %v1027_v36, -inf }
 0x31b   :  { %1038 = vmax.xlane.f32.xlu1 %v1037_v37 }
 0x385   :  { %v711_v38 = vpop.f32.mrb[6].mxu1 }
 0x386   :  { %v637_v39 = vpop.f32.mrb[4].mxu0  ;;  %v4604_v40 = vpop.f32.mrb[7].mxu1  ;;  %v1014_v41 = vmul.f32 0.35355338, %v711_v38 }
 0x387   :  { %v1013_v42 = vmul.f32 0.35355338, %v637_v39  ;;  %v4599_v43 = vpop.f32.mrb[5].mxu0 }
 0x388   :  { %v1029_v46 = vsel %vm5315_vm3, %v1014_v41, -1e+09 }
 0x389   :  { %v1028_v44 = vsel %vm5315_vm3, %v1013_v42, -1e+09  ;;  %v1043_v51 = vsel %vm418_vm2, %v1029_v46, -inf }
 0x38a   :  { %v1040_v45 = vsel %vm418_vm2, %v1028_v44, -inf }
 0x38b   :  { %1041 = vmax.xlane.f32.xlu0 %v1040_v45 }
 0x38d   :  { %v859_v47 = vpop.f32.mrb[8].mxu1 }
 0x38e   :  { %v1016_v48 = vmul.f32 0.35355338, %v859_v47  ;;  %v785_v49 = vpop.f32.mrb[6].mxu0  ;;  %v4614_v50 = vpop.f32.mrb[9].mxu1 }
 0x38f   :  { %v1015_v52 = vmul.f32 0.35355338, %v785_v49  ;;  %v4609_v53 = vpop.f32.mrb[7].mxu0  ;;  %1044 = vmax.xlane.f32.xlu0 %v1043_v51 }
 0x390   :  { %v5333_v55 = vsel %vm5315_vm3, %v1016_v48, -1e+09 }
 0x391   :  { %v1049_v56 = vsel %vm418_vm2, %v5333_v55, -inf  ;;  %v1030_v57 = vsel %vm5315_vm3, %v1015_v52, -1e+09 }
 0x392   :  { %1050 = vmax.xlane.f32.xlu1 %v1049_v56  ;;  %v1046_v58 = vsel %vm418_vm2, %v1030_v57, -inf }
 0x393   :  { %1047 = vmax.xlane.f32.xlu0 %v1046_v58 }
 0x395   :  { %v1007_v59 = vpop.f32.mrb[10].mxu1 }
 0x396   :  { %v1018_v60 = vmul.f32 0.35355338, %v1007_v59  ;;  %v933_v61 = vpop.f32.mrb[8].mxu0  ;;  %v4624_v62 = vpop.f32.mrb[11].mxu1 }
 0x397   :  { %v1017_v63 = vmul.f32 0.35355338, %v933_v61  ;;  %v4619_v2 = vpop.f32.mrb[9].mxu0 }
 0x398   :  { %v5342_v3 = vsel %vm5315_vm3, %v1018_v60, -1e+09 }
 0x399   :  { %v1055_v6 = vsel %vm418_vm2, %v5342_v3, -inf  ;;  %v1032_v7 = vsel %vm5315_vm3, %v1017_v63, -1e+09 }
 0x39a   :  { %1056 = vmax.xlane.f32.xlu1 %v1055_v6  ;;  %v1052_v8 = vsel %vm418_vm2, %v1032_v7, -inf }
 0x39b   :  { %1053 = vmax.xlane.f32.xlu0 %v1052_v8 }
 0x3a4   :  { %v1036_v9 = vpop.xlane.xlu0 %1035 }
 0x3a5   :  { %v1058_v10 = vsub.f32 %v1026_v31, %v1036_v9 }
 0x3a7   :  { %v1066_v11 = vmul.f32 1.442695, %v1058_v10 }
 0x3a8   :  { %v1039_v12 = vpop.xlane.xlu1 %1038 }
 0x3a9   :  { %4985 = vpow2.f32 %v1066_v11  ;;  %v1059_v13 = vsub.f32 %v1027_v36, %v1039_v12 }
 0x3ab   :  { %v1068_v14 = vmul.f32 1.442695, %v1059_v13 }
 0x3ad   :  { %4987 = vpow2.f32 %v1068_v14 }
 0x3b3   :  { %v4986_v15 = vpop.eup %4985 }
 0x3b4   :  { %v1082_v16 = vsel %vm418_vm2, %v4986_v15, 0.0 }
 0x3b5   :  { %1083 = vadd.xlane.f32.xlu0 %v1082_v16 }
 0x3b7   :  { %v4988_v19 = vpop.eup %4987 }
 0x3b8   :  { %v1085_v21 = vsel %vm418_vm2, %v4988_v19, 0.0 }
 0x3b9   :  { %1086 = vadd.xlane.f32.xlu1 %v1085_v21 }
 0x418   :  { %v1042_v23 = vpop.xlane.xlu0 %1041 }
 0x419   :  { %v1060_v24 = vsub.f32 %v1028_v44, %v1042_v23 }
 0x41b   :  { %v1070_v25 = vmul.f32 1.442695, %v1060_v24 }
 0x41c   :  { %v1045_v26 = vpop.xlane.xlu0 %1044 }
 0x41d   :  { %4989 = vpow2.f32 %v1070_v25  ;;  %v1061_v27 = vsub.f32 %v1029_v46, %v1045_v26 }
 0x41f   :  { %v1072_v28 = vmul.f32 1.442695, %v1061_v27  ;;  %v1051_v34 = vpop.xlane.xlu1 %1050 }
 0x420   :  { %v1048_v33 = vpop.xlane.xlu0 %1047  ;;  %v1063_v47 = vsub.f32 %v5333_v55, %v1051_v34 }
 0x421   :  { %4991 = vpow2.f32 %v1072_v28  ;;  %v1062_v39 = vsub.f32 %v1030_v57, %v1048_v33 }
 0x422   :  { %v1076_v48 = vmul.f32 1.442695, %v1063_v47 }
 0x423   :  { %v1074_v40 = vmul.f32 1.442695, %v1062_v39 }
 0x427   :  { %v5351_v29 = vpop.eup %4989  ;;  %v1057_v36 = vpop.xlane.xlu1 %1056 }
 0x428   :  { %v1088_v30 = vsel %vm418_vm2, %v5351_v29, 0.0  ;;  %v1054_v35 = vpop.xlane.xlu0 %1053  ;;  %v1065_v49 = vsub.f32 %v5342_v3, %v1057_v36 }
 0x429   :  { %1089 = vadd.xlane.f32.xlu0 %v1088_v30  ;;  %v1064_v41 = vsub.f32 %v1032_v7, %v1054_v35 }
 0x42a   :  { %v1080_v51 = vmul.f32 1.442695, %v1065_v49 }
 0x42b   :  { %v5355_v31 = vpop.eup %4991  ;;  %v1078_v44 = vmul.f32 1.442695, %v1064_v41 }
 0x42c   :  { %v1091_v32 = vsel %vm418_vm2, %v5355_v31, 0.0 }
 0x42d   :  { %1092 = vadd.xlane.f32.xlu1 %v1091_v32 }
 0x43e   :  { %402 = vrot.lane.b32.xlu1 %v5301_v20, %s5139_s27 }
 0x43f   :  { %400 = vrot.lane.b32.xlu0 %v5303_v22, %s5139_s27 }
 0x442   :  { %v1084_v37 = vpop.xlane.xlu0 %1083  ;;  %406 = vrot.lane.b32.xlu1 %v5303_v22, %s5140_s28 }
 0x443   :  { %4993 = vrcp.f32 %v1084_v37 }
 0x446   :  { %408 = vrot.lane.b32.xlu1 %v5301_v20, %s5140_s28  ;;  %v1087_v38 = vpop.xlane.xlu1 %1086 }
 0x447   :  { %4995 = vrcp.f32 %v1087_v38 }
 0x448   :  { %4997 = vpow2.f32 %v1074_v40 }
 0x449   :  { %4999 = vpow2.f32 %v1078_v44 }
 0x44a   :  { %5001 = vpow2.f32 %v1076_v48 }
 0x44b   :  { %5003 = vpow2.f32 %v1080_v51  ;;  %v5432_v51 = vld [vmem:[#allocation5 + $0x38] sm:$0xff] }
 0x44d   :  { %v4994_v42 = vpop.eup %4993 }
 0x44e   :  { %v1114_v43 = vmul.f32 %v4994_v42, %v4986_v15  ;;  %v4363_v42 = vld [vmem:[%s5690_s3 + $0x9] ss:$0 sm:$0xff] }
 0x450   :  { %4628 = vmatmul.mubr.msk.f32.vlgmr.msra.gmra.mrb[10].mxu0 %vm418_vm2, %v1114_v43 }
 0x451   :  { %v4996_v45 = vpop.eup %4995  ;;  %4637 = vmatprep.mubr.msk.f32.mxu0 %vm5138_vm1, %v5137_v54 }
 0x452   :  { %v1115_v46 = vmul.f32 %v4996_v45, %v4988_v19  ;;  %v4998_v50 = vpop.eup %4997 }
 0x453   :  { %v1094_v52 = vsel %vm418_vm2, %v4998_v50, 0.0  ;;  %v5000_v53 = vpop.eup %4999 }
 0x454   :  { %4633 = vmatmul.mubr.msk.f32.vlgmr.msra.gmra.mrb[12].mxu1 %vm418_vm2, %v1115_v46  ;;  %v1100_v56 = vsel %vm418_vm2, %v5000_v53, 0.0  ;;  %v5002_v55 = vpop.eup %5001 }
 0x455   :  { %4642 = vmatprep.mubr.msk.f32.mxu1 %vm5138_vm1, %v5137_v54  ;;  %v1097_v57 = vsel %vm418_vm2, %v5002_v55, 0.0  ;;  %v5004_v58 = vpop.eup %5003 }
 0x456   :  { %v1103_v59 = vsel %vm418_vm2, %v5004_v58, 0.0 }
 0x45e   :  { %1095 = vadd.xlane.f32.xlu0 %v1094_v52  ;;  %v5434_v52 = vld [vmem:[#allocation5 + $0x50] sm:$0xff] }
 0x462   :  { %1101 = vadd.xlane.f32.xlu0 %v1100_v56  ;;  %v5440_v56 = vld [vmem:[#allocation5 + $0x20] sm:$0xff] }
 0x46a   :  { %1098 = vadd.xlane.f32.xlu1 %v1097_v57 }
 0x46e   :  { %1104 = vadd.xlane.f32.xlu1 %v1103_v59 }
 0x478   :  { %412 = vrot.lane.b32.xlu0 %v5303_v22, %s5141_s29 }
 0x47c   :  { %1709 = vrot.lane.b32.xlu0 %v5206_v5, %s5142_s6 }
 0x47f   :  { %414 = vrot.lane.b32.xlu1 %v5301_v20, %s5141_s29 }
 0x480   :  { %1880 = vrot.lane.b32.xlu0 %v5215_v17, %s5142_s6 }
 0x483   :  { %1794 = vrot.lane.b32.xlu1 %v5204_v4, %s5142_s6 }
 0x487   :  { %1968 = vrot.lane.b32.xlu1 %v5217_v18, %s5142_s6 }
 0x4b6   :  { %v1090_v60 = vpop.xlane.xlu0 %1089 }
 0x4b7   :  { %5005 = vrcp.f32 %v1090_v60 }
 0x4ba   :  { %v401_v61 = vpop.permute.xlu0 %400  ;;  %v1093_v22 = vpop.xlane.xlu1 %1092 }
 0x4bb   :  { %5007 = vrcp.f32 %v1093_v22  ;;  %4636 = vmatpush3.msra.mxu0 %v401_v61 }
 0x4bc   :  { %4645 = vmatprep.subr.mxu0 %v5137_v54 }
 0x4be   :  { %v403_v20 = vpop.permute.xlu1 %402 }
 0x4bf   :  { %4641 = vmatpush3.msra.mxu1 %v403_v20 }
 0x4c0   :  { %4650 = vmatprep.subr.mxu1 %v5137_v54 }
 0x4c1   :  { %v5006_v5 = vpop.eup %5005 }
 0x4c2   :  { %v1116_v4 = vmul.f32 %v5006_v5, %v5351_v29  ;;  %v407_v62 = vpop.permute.xlu1 %406 }
 0x4c4   :  { %4638 = vmatmul.mubr.msk.f32.vlgmr.msra.gmra.mrb[12].mxu0 %vm418_vm2, %v1116_v4 }
 0x4c5   :  { %v5008_v17 = vpop.eup %5007  ;;  %4646 = vmatpush3.msra.mxu0 %v407_v62  ;;  %4647 = vmatprep.mubr.msk.f32.mxu0 %vm5138_vm1, %v5137_v54 }
 0x4c6   :  { %v1117_v18 = vmul.f32 %v5008_v17, %v5355_v31  ;;  %v409_v63 = vpop.permute.xlu1 %408  ;;  %4655 = vmatprep.subr.mxu0 %v5137_v54  ;;  %v4868_v17 = vpack.c.bf16 %v5434_v52, %v5432_v51 }
 0x4c8   :  { %4643 = vmatmul.mubr.msk.f32.vlgmr.msra.gmra.mrb[14].mxu1 %vm418_vm2, %v1117_v18  ;;  %v48_v18 = vld [vmem:[%s5688_s1] sm:$0xff] }
 0x4c9   :  { %4651 = vmatpush3.msra.mxu1 %v409_v63  ;;  %4652 = vmatprep.mubr.msk.f32.mxu1 %vm5138_vm1, %v5137_v54 }
 0x4ca   :  { %4660 = vmatprep.subr.mxu1 %v5137_v54 }
 0x4eb   :  { %v1096_v2 = vpop.xlane.xlu0 %1095 }
 0x4ec   :  { %5009 = vrcp.f32 %v1096_v2 }
 0x4ef   :  { %v1102_v3 = vpop.xlane.xlu0 %1101 }
 0x4f0   :  { %5011 = vrcp.f32 %v1102_v3 }
 0x4f3   :  { %v413_v9 = vpop.permute.xlu0 %412 }
 0x4f6   :  { %v5010_v6 = vpop.eup %5009 }
 0x4f7   :  { %v1118_v7 = vmul.f32 %v5010_v6, %v4998_v50  ;;  %v1099_v8 = vpop.xlane.xlu1 %1098  ;;  %v1710_v21 = vpop.permute.xlu0 %1709 }
 0x4f8   :  { %5013 = vrcp.f32 %v1099_v8 }
 0x4f9   :  { %4648 = vmatmul.mubr.msk.f32.vlgmr.msra.gmra.mrb[14].mxu0 %vm418_vm2, %v1118_v7 }
 0x4fa   :  { %v5012_v10 = vpop.eup %5011  ;;  %4656 = vmatpush3.msra.mxu0 %v413_v9  ;;  %4657 = vmatprep.mubr.msk.f32.mxu0 %vm5138_vm1, %v5137_v54 }
 0x4fb   :  { %v1120_v11 = vmul.f32 %v5012_v10, %v5000_v53  ;;  %v1105_v12 = vpop.xlane.xlu1 %1104  ;;  %4665 = vmatprep.subr.mxu0 %v1710_v21  ;;  %v1881_v31 = vpop.permute.xlu0 %1880  ;;  %v4956_v53 = vpack.i.bf16 %v5434_v52, %v5432_v51 }
 0x4fc   :  { %5015 = vrcp.f32 %v1105_v12 }
 0x4fd   :  { %4658 = vmatmul.mubr.msk.f32.vlgmr.msra.gmra.mrb[16].mxu0 %vm418_vm2, %v1120_v11 }
 0x4fe   :  { %4666 = vmatpush3.msra.mxu0 %v1710_v21 }
 0x4ff   :  { %v415_v15 = vpop.permute.xlu1 %414 }
 0x502   :  { %v5014_v13 = vpop.eup %5013 }
 0x503   :  { %v1119_v14 = vmul.f32 %v5014_v13, %v5002_v55  ;;  %v1795_v23 = vpop.permute.xlu1 %1794 }
 0x504   :  { %4670 = vmatprep.subr.mxu0 %v1795_v23 }
 0x505   :  { %4653 = vmatmul.mubr.msk.f32.vlgmr.msra.gmra.mrb[16].mxu1 %vm418_vm2, %v1119_v14  ;;  %v4364_v14 = vld [vmem:[%s5690_s3 + $0x2] ss:$0 sm:$0xff] }
 0x506   :  { %v5016_v16 = vpop.eup %5015  ;;  %4661 = vmatpush3.msra.mxu1 %v415_v15  ;;  %4662 = vmatprep.mubr.msk.f32.mxu1 %vm5138_vm1, %v5137_v54 }
 0x507   :  { %v1121_v19 = vmul.f32 %v5016_v16, %v5004_v58  ;;  %v1969_v33 = vpop.permute.xlu1 %1968  ;;  %v4365_v16 = vld [vmem:[%s5690_s3 + $0x3] ss:$0 sm:$0xff] }
 0x509   :  { %4663 = vmatmul.mubr.msk.f32.vlgmr.msra.gmra.mrb[18].mxu1 %vm418_vm2, %v1121_v19 }
 0x523   :  { %v1191_v24 = vpop.f32.mrb[10].mxu0 }
 0x524   :  { %v4629_v25 = vpop.f32.mrb[11].mxu0 }
 0x527   :  { %v1264_v26 = vpop.f32.mrb[12].mxu1 }
 0x528   :  { %v4634_v27 = vpop.f32.mrb[13].mxu1 }
 0x597   :  { %v1337_v28 = vpop.f32.mrb[12].mxu0 }
 0x598   :  { %v4639_v29 = vpop.f32.mrb[13].mxu0  ;;  %4667 = vmatprep.mubr.msk.f32.mxu0 %vm418_vm2, %v1337_v28 }
 0x59b   :  { %v1410_v30 = vpop.f32.mrb[14].mxu1 }
 0x59c   :  { %v4644_v32 = vpop.f32.mrb[15].mxu1  ;;  %4668 = vmatmul.mubr.msk.f32.vlgmr.msra.gmra.mrb[18].mxu0 %vm418_vm2, %v1410_v30 }
 0x59d   :  { %4672 = vmatprep.mubr.msk.f32.mxu0 %vm418_vm2, %v1191_v24  ;;  %4671 = vmatpush3.msra.mxu0 %v1795_v23 }
 0x59e   :  { %4675 = vmatprep.subr.mxu0 %v1881_v31 }
 0x5a4   :  { %4673 = vmatmul.mubr.msk.f32.vlgmr.msra.gmra.mrb[18].mxu0 %vm418_vm2, %v1264_v26 }
 0x5a5   :  { %4676 = vmatpush3.msra.mxu0 %v1881_v31  ;;  %v49_v31 = vld [vmem:[%s5688_s1 + $0x8] sm:$0xff] }
 0x5a6   :  { %4680 = vmatprep.subr.mxu0 %v1969_v33 }
 0x5cc   :  { %v1483_v34 = vpop.f32.mrb[14].mxu0 }
 0x5cd   :  { %v4649_v35 = vpop.f32.mrb[15].mxu0  ;;  %4677 = vmatprep.mubr.msk.f32.mxu0 %vm418_vm2, %v1483_v34 }
 0x5d0   :  { %v1629_v36 = vpop.f32.mrb[16].mxu0 }
 0x5d1   :  { %v4659_v37 = vpop.f32.mrb[17].mxu0 }
 0x5d8   :  { %v1556_v38 = vpop.f32.mrb[16].mxu1 }
 0x5d9   :  { %v4654_v39 = vpop.f32.mrb[17].mxu1  ;;  %4678 = vmatmul.mubr.msk.f32.vlgmr.msra.gmra.mrb[18].mxu0 %vm418_vm2, %v1556_v38 }
 0x5da   :  { %4681 = vmatpush3.msra.mxu0 %v1969_v33  ;;  %4682 = vmatprep.mubr.msk.f32.mxu0 %vm418_vm2, %v1629_v36 }
 0x5dc   :  { %v1702_v40 = vpop.f32.mrb[18].mxu1 }
 0x5dd   :  { %v4664_v41 = vpop.f32.mrb[19].mxu1 }
 0x5e1   :  { %4683 = vmatmul.mubr.msk.f32.vlgmr.msra.gmra.mrb[18].mxu0 %vm418_vm2, %v1702_v40 }
 0x5e2   :  { %4715 = vmatprep.mubr.msk.f32.mxu0 %vm52_vm0, %v48_v18 }
 0x6b4   :  { %v4684_v43 = vpop.f32.mrb[18].mxu0 }
 0x6b5   :  { %v2060_v44 = vadd.f32 %v4684_v43, %v4363_v42  ;;  %v2043_v45 = vpop.f32.mrb[19].mxu0 }
 0x6b6   :  { %v2059_v46 = vadd.f32 %v4363_v42, %v2043_v45  ;;  %v4369_v42 = vld [vmem:[%s5690_s3 + $0xb] ss:$0 sm:$0xff] }
 0x6b7   :  { %v5423_v47 = vadd.f32 %v2060_v44, %v5198_v1  ;;  %v5438_v1 = vld [vmem:[#allocation5 + $0x8] sm:$0xff] }
 0x6b8   :  { %v5426_v48 = vadd.f32 %v2059_v46, %v5196_v0  ;;  %v4951_v0 = vpack.i.bf16 %v5440_v56, %v5438_v1  ;;  %v4864_v62 = vpack.c.bf16 %v5440_v56, %v5438_v1  ;;  %v4366_v46 = vld [vmem:[%s5690_s3 + $0xa] ss:$0 sm:$0xff] }
 0x6b9   :  { %v2068_v49 = vsel %vm52_vm0, %v5423_v47, 0.0 }
 0x6ba   :  { %2069 = vadd.xlane.f32.xlu1 %v2068_v49  ;;  %v2065_v50 = vsel %vm52_vm0, %v5426_v48, 0.0  ;;  %4865 = vmatprep.subr.bf16.mxu1 %v4864_v62 }
 0x6bb   :  { %2066 = vadd.xlane.f32.xlu0 %v2065_v50  ;;  %4867 = vmatpush3.bf16.msra.mxu1 %v4864_v62 }
 0x6bc   :  { %4869 = vmatprep.subr.bf16.mxu1 %v4868_v17 }
 0x6bf   :  { %4871 = vmatpush3.bf16.msra.mxu1 %v4868_v17 }
 0x6cb   :  { %4957 = vrot.lane.b32.xlu1 %v4956_v53, %s5135_s2 }
 0x6cf   :  { %4962 = vrot.lane.b32.xlu1 %v4951_v0, %s5136_s16 }
 0x6d3   :  { %4967 = vrot.lane.b32.xlu1 %v4956_v53, %s5136_s16 }
 0x747   :  { %v2070_v55 = vpop.xlane.xlu1 %2069 }
 0x748   :  { %v2072_v57 = vmul.f32 0.03125, %v2070_v55  ;;  %v2067_v58 = vpop.xlane.xlu0 %2066 }
 0x749   :  { %v2071_v59 = vmul.f32 0.03125, %v2067_v58 }
 0x74a   :  { %v2074_v60 = vsub.f32 %v5423_v47, %v2072_v57 }
 0x74b   :  { %v2073_v61 = vsub.f32 %v5426_v48, %v2071_v59  ;;  %v4958_v19 = vpop.permute.xlu1 %4957 }
 0x74c   :  { %v2076_v5 = vmul.f32 %v2074_v60, %v2074_v60  ;;  %v4960_v26 = vunpack.i.h.bf16 %v4958_v19  ;;  %v4959_v27 = vunpack.i.l.bf16 %v4958_v19 }
 0x74d   :  { %v2075_v22 = vmul.f32 %v2073_v61, %v2073_v61 }
 0x74e   :  { %v2080_v4 = vsel %vm52_vm0, %v2076_v5, 0.0  ;;  %v4876_v30 = vpack.c.bf16 %v4960_v26, %v4959_v27 }
 0x74f   :  { %v2077_v20 = vsel %vm52_vm0, %v2075_v22, 0.0  ;;  %v4963_v32 = vpop.permute.xlu1 %4962 }
 0x750   :  { %2078 = vadd.xlane.f32.xlu0 %v2077_v20  ;;  %v4965_v33 = vunpack.i.h.bf16 %v4963_v32  ;;  %v4964_v34 = vunpack.i.l.bf16 %v4963_v32 }
 0x752   :  { %v4880_v35 = vpack.c.bf16 %v4965_v33, %v4964_v34 }
 0x753   :  { %v4968_v36 = vpop.permute.xlu1 %4967 }
 0x754   :  { %2081 = vadd.xlane.f32.xlu0 %v2080_v4  ;;  %v4970_v37 = vunpack.i.h.bf16 %v4968_v36  ;;  %v4969_v38 = vunpack.i.l.bf16 %v4968_v36  ;;  %4881 = vmatprep.subr.bf16.mxu0 %v4880_v35  ;;  %v4372_v4 = vld [vmem:[%s5690_s3 + $0xc] ss:$0 sm:$0xff] }
 0x755   :  { %4883 = vmatpush3.bf16.msra.mxu0 %v4880_v35 }
 0x756   :  { %v4884_v39 = vpack.c.bf16 %v4970_v37, %v4969_v38 }
 0x758   :  { %4885 = vmatprep.subr.bf16.mxu0 %v4884_v39 }
 0x759   :  { %4887 = vmatpush3.bf16.msra.mxu0 %v4884_v39 }
 0x75a   :  { %4728 = vmatprep.subr.mxu0 %v5137_v54 }
 0x75c   :  { %4716 = vmatmul.mubr.msk.f32.vlgmr.msra.gmra.mrb[20].mxu0 %vm52_vm0, %v49_v31 }
 0x75d   :  { %4730 = vmatprep.mubr.msk.f32.mxu0 %vm5138_vm1, %v5137_v54 }
 0x76a   :  { %4952 = vrot.lane.b32.xlu0 %v4951_v0, %s5135_s2 }
 0x7dd   :  { %v2079_v63 = vpop.xlane.xlu0 %2078 }
 0x7de   :  { %v2083_v2 = vmul.f32 0.03125, %v2079_v63 }
 0x7e0   :  { %v2085_v3 = vadd.f32 1e-06, %v2083_v2 }
 0x7e1   :  { %v2082_v6 = vpop.xlane.xlu0 %2081 }
 0x7e2   :  { %5017 = vrsqrt.f32 %v2085_v3  ;;  %v2084_v7 = vmul.f32 0.03125, %v2082_v6 }
 0x7e4   :  { %v2086_v8 = vadd.f32 1e-06, %v2084_v7 }
 0x7e5   :  { %v4953_v9 = vpop.permute.xlu0 %4952 }
 0x7e6   :  { %5019 = vrsqrt.f32 %v2086_v8  ;;  %v4955_v10 = vunpack.i.h.bf16 %v4953_v9  ;;  %v4954_v11 = vunpack.i.l.bf16 %v4953_v9 }
 0x7e8   :  { %v4872_v12 = vpack.c.bf16 %v4955_v10, %v4954_v11 }
 0x7ea   :  { %4873 = vmatprep.subr.bf16.mxu1 %v4872_v12 }
 0x7ec   :  { %v5018_v13 = vpop.eup %5017 }
 0x7ed   :  { %v2089_v15 = vmul.f32 %v5018_v13, %v2073_v61 }
 0x7ef   :  { %v2095_v21 = vmul.f32 %v4364_v14, %v2089_v15 }
 0x7f0   :  { %v5020_v23 = vpop.eup %5019 }
 0x7f1   :  { %v2090_v24 = vmul.f32 %v5020_v23, %v2074_v60  ;;  %v2101_v25 = vadd.f32 %v4365_v16, %v2095_v21 }
 0x7f3   :  { %v2096_v28 = vmul.f32 %v4364_v14, %v2090_v24  ;;  %4693 = vmatprep.mubr.msk.f32.mxu1 %vm52_vm0, %v2101_v25 }
 0x7f5   :  { %v2102_v29 = vadd.f32 %v4365_v16, %v2096_v28 }
 0x7f7   :  { %4694 = vmatmul.mubr.msk.f32.vlgmr.msra.gmra.mrb[20].mxu1 %vm52_vm0, %v2102_v29 }
 0x7f8   :  { %4875 = vmatpush3.bf16.msra.mxu1 %v4872_v12  ;;  %4704 = vmatprep.mubr.msk.f32.mxu1 %vm52_vm0, %v48_v18 }
 0x7f9   :  { %4877 = vmatprep.subr.bf16.mxu1 %v4876_v30 }
 0x7fc   :  { %4879 = vmatpush3.bf16.msra.mxu1 %v4876_v30 }
 0x7fd   :  { %4718 = vmatprep.subr.mxu1 %v5137_v54 }
 0x7ff   :  { %4705 = vmatmul.mubr.msk.f32.vlgmr.msra.gmra.mrb[22].mxu1 %vm52_vm0, %v49_v31 }
 0x800   :  { %4720 = vmatprep.mubr.msk.f32.mxu1 %vm5138_vm1, %v5137_v54 }
 0x82f   :  { %v4717_v57 = vpop.f32.mrb[20].mxu0 }
 0x830   :  { %v2378_v59 = vpop.f32.mrb[21].mxu0  ;;  %v5533_v18 = vadd.f32 %v4717_v57, %v4372_v4 }
 0x831   :  { %v5536_v63 = vadd.f32 %v4372_v4, %v2378_v59 }
 0x8ca   :  { %v4695_v40 = vpop.f32.mrb[20].mxu1 }
 0x8cb   :  { %v2184_v41 = vpop.f32.mrb[21].mxu1  ;;  %v2190_v50 = vadd.f32 %v4695_v40, %v4366_v46 }
 0x8cc   :  { %v2185_v53 = vadd.f32 %v4366_v46, %v2184_v41 }
 0x8d2   :  { %v4706_v43 = vpop.f32.mrb[22].mxu1 }
 0x8d3   :  { %v2292_v44 = vadd.f32 %v4706_v43, %v4369_v42  ;;  %v2286_v45 = vpop.f32.mrb[23].mxu1 }
 0x8d4   :  { %v2287_v49 = vadd.f32 %v4369_v42, %v2286_v45 }
 0x8d5   :  { %2405 = vrot.lane.b32.xlu1 %v2292_v44, %s5139_s27 }
 0x8d6   :  { %2403 = vrot.lane.b32.xlu0 %v2287_v49, %s5139_s27  ;;  %4719 = vmatpush3.xpose.msk.msra.mxu1 %vm418_vm2, %v2287_v49 }
 0x8d7   :  { %4723 = vmatprep.subr.mxu1 %v5137_v54 }
 0x8d9   :  { %2391 = vrot.lane.b32.xlu1 %v2190_v50, %s5139_s27  ;;  %4721 = vmatmul.mubr.msk.f32.vlgmr.msra.gmra.mrb[24].mxu1 %vm418_vm2, %v2185_v53 }
 0x8da   :  { %2389 = vrot.lane.b32.xlu0 %v2185_v53, %s5139_s27  ;;  %4724 = vmatpush3.xpose.msk.msra.mxu1 %vm418_vm2, %v2292_v44 }
 0x8db   :  { %4725 = vmatprep.mubr.msk.f32.mxu1 %vm5138_vm1, %v5137_v54  ;;  %4733 = vmatprep.subr.mxu1 %v5137_v54 }
 0x8dd   :  { %2409 = vrot.lane.b32.xlu1 %v2292_v44, %s5140_s28  ;;  %4726 = vmatmul.mubr.msk.f32.vlgmr.msra.gmra.mrb[26].mxu1 %vm418_vm2, %v2190_v50 }
 0x8de   :  { %2407 = vrot.lane.b32.xlu0 %v2287_v49, %s5140_s28  ;;  %4735 = vmatprep.mubr.msk.f32.mxu1 %vm5138_vm1, %v5137_v54 }
 0x8e1   :  { %2395 = vrot.lane.b32.xlu1 %v2190_v50, %s5140_s28 }
 0x8e2   :  { %2393 = vrot.lane.b32.xlu0 %v2185_v53, %s5140_s28 }
 0x8e5   :  { %2413 = vrot.lane.b32.xlu1 %v2292_v44, %s5141_s29 }
 0x8e6   :  { %2411 = vrot.lane.b32.xlu0 %v2287_v49, %s5141_s29 }
 0x8e9   :  { %2399 = vrot.lane.b32.xlu1 %v2190_v50, %s5141_s29 }
 0x8ea   :  { %2397 = vrot.lane.b32.xlu0 %v2185_v53, %s5141_s29 }
 0x947   :  { %v2406_v0 = vpop.permute.xlu1 %2405 }
 0x948   :  { %v2404_v55 = vpop.permute.xlu0 %2403  ;;  %4734 = vmatpush3.xpose.msk.msra.mxu1 %vm418_vm2, %v2406_v0 }
 0x949   :  { %4729 = vmatpush3.xpose.msk.msra.mxu0 %vm418_vm2, %v2404_v55  ;;  %4743 = vmatprep.subr.mxu1 %v5137_v54 }
 0x94a   :  { %4738 = vmatprep.subr.mxu0 %v5137_v54 }
 0x94b   :  { %v2392_v58 = vpop.permute.xlu1 %2391 }
 0x94c   :  { %v2390_v60 = vpop.permute.xlu0 %2389  ;;  %4736 = vmatmul.mubr.msk.f32.vlgmr.msra.gmra.mrb[28].mxu1 %vm418_vm2, %v2392_v58 }
 0x94d   :  { %4731 = vmatmul.mubr.msk.f32.vlgmr.msra.gmra.mrb[22].mxu0 %vm418_vm2, %v2390_v60  ;;  %4745 = vmatprep.mubr.msk.f32.mxu1 %vm5138_vm1, %v5137_v54 }
 0x94e   :  { %4740 = vmatprep.mubr.msk.f32.mxu0 %vm5138_vm1, %v5137_v54 }
 0x94f   :  { %v2410_v61 = vpop.permute.xlu1 %2409 }
 0x950   :  { %v2408_v22 = vpop.permute.xlu0 %2407  ;;  %4744 = vmatpush3.xpose.msk.msra.mxu1 %vm418_vm2, %v2410_v61 }
 0x951   :  { %4739 = vmatpush3.xpose.msk.msra.mxu0 %vm418_vm2, %v2408_v22  ;;  %4753 = vmatprep.subr.mxu1 %v5137_v54 }
 0x952   :  { %4748 = vmatprep.subr.mxu0 %v5137_v54 }
 0x953   :  { %v2396_v20 = vpop.permute.xlu1 %2395 }
 0x954   :  { %v2394_v5 = vpop.permute.xlu0 %2393  ;;  %4746 = vmatmul.mubr.msk.f32.vlgmr.msra.gmra.mrb[30].mxu1 %vm418_vm2, %v2396_v20 }
 0x955   :  { %4741 = vmatmul.mubr.msk.f32.vlgmr.msra.gmra.mrb[24].mxu0 %vm418_vm2, %v2394_v5  ;;  %4755 = vmatprep.mubr.msk.f32.mxu1 %vm5138_vm1, %v5137_v54 }
 0x956   :  { %4750 = vmatprep.mubr.msk.f32.mxu0 %vm5138_vm1, %v5137_v54 }
 0x957   :  { %v2414_v62 = vpop.permute.xlu1 %2413 }
 0x958   :  { %v2412_v17 = vpop.permute.xlu0 %2411  ;;  %4754 = vmatpush3.xpose.msk.msra.mxu1 %vm418_vm2, %v2414_v62 }
 0x959   :  { %4749 = vmatpush3.xpose.msk.msra.mxu0 %vm418_vm2, %v2412_v17  ;;  %4763 = vmatprep.subr.mxu1 %v5137_v54 }
 0x95a   :  { %4758 = vmatprep.subr.mxu0 %v5137_v54 }
 0x95b   :  { %v2400_v2 = vpop.permute.xlu1 %2399 }
 0x95c   :  { %v2398_v3 = vpop.permute.xlu0 %2397  ;;  %4756 = vmatmul.mubr.msk.f32.vlgmr.msra.gmra.mrb[32].mxu1 %vm418_vm2, %v2400_v2 }
 0x95d   :  { %4751 = vmatmul.mubr.msk.f32.vlgmr.msra.gmra.mrb[26].mxu0 %vm418_vm2, %v2398_v3  ;;  %4764 = vmatpush3.msra.mxu1 %v5533_v18 }
 0x95e   :  { %4759 = vmatpush3.msra.mxu0 %v5536_v63  ;;  %4760 = vmatprep.mubr.msk.f32.mxu0 %vm5138_vm1, %v5137_v54 }
 0x95f   :  { %4765 = vmatprep.mubr.msk.f32.mxu1 %vm5138_vm1, %v5137_v54  ;;  %4768 = vmatprep.subr.mxu0 %v5137_v54 }
 0x960   :  { %4773 = vmatprep.subr.mxu1 %v5137_v54 }
 0x9ac   :  { %v2505_v6 = vpop.f32.mrb[24].mxu1 }
 0x9ad   :  { %v3027_v7 = vmul.f32 0.35355338, %v2505_v6  ;;  %v4722_v8 = vpop.f32.mrb[25].mxu1 }
 0x9af   :  { %v3035_v9 = vsel %vm418_vm2, %v3027_v7, -inf }
 0x9b0   :  { %3036 = vmax.xlane.f32.xlu0 %v3035_v9  ;;  %v2579_v10 = vpop.f32.mrb[26].mxu1 }
 0x9b1   :  { %v3028_v11 = vmul.f32 0.35355338, %v2579_v10  ;;  %v4727_v12 = vpop.f32.mrb[27].mxu1 }
 0x9b3   :  { %v3038_v13 = vsel %vm418_vm2, %v3028_v11, -inf }
 0x9b4   :  { %3039 = vmax.xlane.f32.xlu1 %v3038_v13 }
 0xa1f   :  { %v2727_v14 = vpop.f32.mrb[28].mxu1 }
 0xa20   :  { %v2653_v15 = vpop.f32.mrb[22].mxu0  ;;  %v4737_v16 = vpop.f32.mrb[29].mxu1  ;;  %v3030_v23 = vmul.f32 0.35355338, %v2727_v14 }
 0xa21   :  { %v3029_v19 = vmul.f32 0.35355338, %v2653_v15  ;;  %v4732_v21 = vpop.f32.mrb[23].mxu0 }
 0xa22   :  { %v3044_v26 = vsel %vm418_vm2, %v3030_v23, -inf }
 0xa23   :  { %v3041_v24 = vsel %vm418_vm2, %v3029_v19, -inf }
 0xa24   :  { %3042 = vmax.xlane.f32.xlu0 %v3041_v24 }
 0xa27   :  { %v2875_v25 = vpop.f32.mrb[30].mxu1 }
 0xa28   :  { %v5553_v27 = vmul.f32 0.35355338, %v2875_v25  ;;  %v2801_v28 = vpop.f32.mrb[24].mxu0  ;;  %3045 = vmax.xlane.f32.xlu0 %v3044_v26  ;;  %v4747_v29 = vpop.f32.mrb[31].mxu1 }
 0xa29   :  { %v3031_v30 = vmul.f32 0.35355338, %v2801_v28  ;;  %v4742_v31 = vpop.f32.mrb[25].mxu0 }
 0xa2a   :  { %v3050_v32 = vsel %vm418_vm2, %v5553_v27, -inf }
 0xa2b   :  { %3051 = vmax.xlane.f32.xlu1 %v3050_v32  ;;  %v3047_v33 = vsel %vm418_vm2, %v3031_v30, -inf }
 0xa2c   :  { %3048 = vmax.xlane.f32.xlu0 %v3047_v33 }
 0xa2f   :  { %v3023_v34 = vpop.f32.mrb[32].mxu1 }
 0xa30   :  { %v5558_v35 = vmul.f32 0.35355338, %v3023_v34  ;;  %v2949_v36 = vpop.f32.mrb[26].mxu0  ;;  %v4757_v37 = vpop.f32.mrb[33].mxu1 }
 0xa31   :  { %v3033_v38 = vmul.f32 0.35355338, %v2949_v36  ;;  %v4752_v39 = vpop.f32.mrb[27].mxu0 }
 0xa32   :  { %v3056_v40 = vsel %vm418_vm2, %v5558_v35, -inf }
 0xa33   :  { %3057 = vmax.xlane.f32.xlu1 %v3056_v40  ;;  %v3053_v41 = vsel %vm418_vm2, %v3033_v38, -inf }
 0xa34   :  { %3054 = vmax.xlane.f32.xlu0 %v3053_v41 }
 0xa3d   :  { %v3037_v42 = vpop.xlane.xlu0 %3036 }
 0xa3e   :  { %v3059_v43 = vsub.f32 %v3027_v7, %v3037_v42 }
 0xa40   :  { %v3067_v44 = vmul.f32 1.442695, %v3059_v43 }
 0xa41   :  { %v3040_v45 = vpop.xlane.xlu1 %3039 }
 0xa42   :  { %5021 = vpow2.f32 %v3067_v44  ;;  %v3060_v46 = vsub.f32 %v3028_v11, %v3040_v45 }
 0xa44   :  { %v3069_v49 = vmul.f32 1.442695, %v3060_v46 }
 0xa46   :  { %5023 = vpow2.f32 %v3069_v49 }
 0xa4c   :  { %v5022_v50 = vpop.eup %5021 }
 0xa4d   :  { %v3083_v53 = vsel %vm418_vm2, %v5022_v50, 0.0 }
 0xa4e   :  { %3084 = vadd.xlane.f32.xlu0 %v3083_v53 }
 0xa50   :  { %v5024_v0 = vpop.eup %5023 }
 0xa51   :  { %v3086_v55 = vsel %vm418_vm2, %v5024_v0, 0.0 }
 0xa52   :  { %3087 = vadd.xlane.f32.xlu1 %v3086_v55 }
 0xab1   :  { %v3043_v57 = vpop.xlane.xlu0 %3042 }
 0xab2   :  { %v3061_v58 = vsub.f32 %v3029_v19, %v3043_v57 }
 0xab4   :  { %v3071_v59 = vmul.f32 1.442695, %v3061_v58 }
 0xab5   :  { %v3046_v60 = vpop.xlane.xlu0 %3045 }
 0xab6   :  { %5025 = vpow2.f32 %v3071_v59  ;;  %v3062_v61 = vsub.f32 %v3030_v23, %v3046_v60 }
 0xab8   :  { %v3073_v22 = vmul.f32 1.442695, %v3062_v61  ;;  %v3052_v2 = vpop.xlane.xlu1 %3051 }
 0xab9   :  { %v3049_v17 = vpop.xlane.xlu0 %3048  ;;  %v3064_v19 = vsub.f32 %v5553_v27, %v3052_v2 }
 0xaba   :  { %5027 = vpow2.f32 %v3073_v22  ;;  %v3063_v9 = vsub.f32 %v3031_v30, %v3049_v17 }
 0xabb   :  { %v3077_v21 = vmul.f32 1.442695, %v3064_v19 }
 0xabc   :  { %v3075_v10 = vmul.f32 1.442695, %v3063_v9 }
 0xac0   :  { %v5565_v20 = vpop.eup %5025  ;;  %v3058_v6 = vpop.xlane.xlu1 %3057 }
 0xac1   :  { %v3089_v5 = vsel %vm418_vm2, %v5565_v20, 0.0  ;;  %v3055_v3 = vpop.xlane.xlu0 %3054  ;;  %v3066_v23 = vsub.f32 %v5558_v35, %v3058_v6 }
 0xac2   :  { %3090 = vadd.xlane.f32.xlu0 %v3089_v5  ;;  %v3065_v11 = vsub.f32 %v3033_v38, %v3055_v3 }
 0xac3   :  { %v3081_v25 = vmul.f32 1.442695, %v3066_v23 }
 0xac4   :  { %v5569_v4 = vpop.eup %5027  ;;  %v3079_v14 = vmul.f32 1.442695, %v3065_v11  ;;  %v4407_v11 = vld [vmem:[%s5690_s3 + $0xd] ss:$0 sm:$0xff] }
 0xac5   :  { %v3092_v62 = vsel %vm418_vm2, %v5569_v4, 0.0 }
 0xac6   :  { %3093 = vadd.xlane.f32.xlu1 %v3092_v62 }
 0xad7   :  { %2419 = vrot.lane.b32.xlu1 %v5533_v18, %s5139_s27 }
 0xad8   :  { %2417 = vrot.lane.b32.xlu0 %v5536_v63, %s5139_s27 }
 0xadb   :  { %v3085_v7 = vpop.xlane.xlu0 %3084  ;;  %2423 = vrot.lane.b32.xlu1 %v5536_v63, %s5140_s28 }
 0xadc   :  { %5029 = vrcp.f32 %v3085_v7 }
 0xadf   :  { %2425 = vrot.lane.b32.xlu1 %v5533_v18, %s5140_s28  ;;  %v3088_v8 = vpop.xlane.xlu1 %3087 }
 0xae0   :  { %5031 = vrcp.f32 %v3088_v8 }
 0xae1   :  { %5033 = vpow2.f32 %v3075_v10 }
 0xae2   :  { %5035 = vpow2.f32 %v3079_v14 }
 0xae3   :  { %5037 = vpow2.f32 %v3077_v21 }
 0xae4   :  { %5039 = vpow2.f32 %v3081_v25 }
 0xae6   :  { %v5030_v12 = vpop.eup %5029 }
 0xae7   :  { %v3115_v13 = vmul.f32 %v5030_v12, %v5022_v50 }
 0xae9   :  { %4761 = vmatmul.mubr.msk.f32.vlgmr.msra.gmra.mrb[28].mxu0 %vm418_vm2, %v3115_v13 }
 0xaea   :  { %v5032_v15 = vpop.eup %5031  ;;  %4770 = vmatprep.mubr.msk.f32.mxu0 %vm5138_vm1, %v5137_v54 }
 0xaeb   :  { %v3116_v16 = vmul.f32 %v5032_v15, %v5024_v0  ;;  %v5034_v24 = vpop.eup %5033 }
 0xaec   :  { %v3095_v26 = vsel %vm418_vm2, %v5034_v24, 0.0  ;;  %v5036_v28 = vpop.eup %5035 }
 0xaed   :  { %4766 = vmatmul.mubr.msk.f32.vlgmr.msra.gmra.mrb[34].mxu1 %vm418_vm2, %v3116_v16  ;;  %v3101_v29 = vsel %vm418_vm2, %v5036_v28, 0.0  ;;  %v5038_v27 = vpop.eup %5037 }
 0xaee   :  { %4775 = vmatprep.mubr.msk.f32.mxu1 %vm5138_vm1, %v5137_v54  ;;  %v3098_v30 = vsel %vm418_vm2, %v5038_v27, 0.0  ;;  %v5040_v31 = vpop.eup %5039 }
 0xaef   :  { %v3104_v32 = vsel %vm418_vm2, %v5040_v31, 0.0 }
 0xaf7   :  { %3096 = vadd.xlane.f32.xlu0 %v3095_v26 }
 0xafb   :  { %3102 = vadd.xlane.f32.xlu0 %v3101_v29 }
 0xb03   :  { %3099 = vadd.xlane.f32.xlu1 %v3098_v30 }
 0xb07   :  { %3105 = vadd.xlane.f32.xlu1 %v3104_v32  ;;  %v4104_v32 = vld [vmem:[#allocation5 + $0x10] sm:$0xff] }
 0xb11   :  { %2429 = vrot.lane.b32.xlu0 %v5536_v63, %s5141_s29 }
 0xb15   :  { %3710 = vrot.lane.b32.xlu0 %v5440_v56, %s5142_s6 }
 0xb18   :  { %2431 = vrot.lane.b32.xlu1 %v5533_v18, %s5141_s29 }
 0xb19   :  { %3881 = vrot.lane.b32.xlu0 %v5432_v51, %s5142_s6 }
 0xb1c   :  { %3795 = vrot.lane.b32.xlu1 %v5438_v1, %s5142_s6 }
 0xb20   :  { %3969 = vrot.lane.b32.xlu1 %v5434_v52, %s5142_s6  ;;  %s5143_s6 = smov [#allocation7]  }
 0xb21   :  { %s4307_s7 = sshll.u32 %s5143_s6, 4  ;;  %s4308_s7 = int_to_ptr.vmem [resolvable:$true] %s4307_s7 }
 0xb22   :  { %s5101_s8 = scalar_lea.vmem %s4308_s7, 256  ;;  %p5106_p3 = scmp.lt.s32.totalorder %s4308_s7, %s4308_s7 }
 0xb23   :  { %p5102_p2 = scmp.ne.s32.totalorder %s4308_s7, %s5101_s8  ;;  %p5107_p4 = scmp.lt.s32.totalorder %s5101_s8, %s5101_s8 }
 0xb25   :  { %p5108_p5 = por %p5107_p4, %p5106_p3 }
 0xb27   :  { %p5109_p6 = pnand %p5108_p5, %p5102_p2 }
 0xb4f   :  { %v3091_v33 = vpop.xlane.xlu0 %3090 }
 0xb50   :  { %5041 = vrcp.f32 %v3091_v33  ;;  %v4105_v33 = vld [vmem:[#allocation5 + $0x28] sm:$0xff] }
 0xb53   :  { %v2418_v34 = vpop.permute.xlu0 %2417  ;;  %v3094_v35 = vpop.xlane.xlu1 %3093 }
 0xb54   :  { %5043 = vrcp.f32 %v3094_v35  ;;  %4769 = vmatpush3.msra.mxu0 %v2418_v34  ;;  %v4888_v34 = vpack.c.bf16 %v4105_v33, %v4104_v32  ;;  %v4106_v35 = vld [vmem:[#allocation5 + $0x40] sm:$0xff] }
 0xb55   :  { %4778 = vmatprep.subr.mxu0 %v5137_v54 }
 0xb57   :  { %v2420_v56 = vpop.permute.xlu1 %2419 }
 0xb58   :  { %4774 = vmatpush3.msra.mxu1 %v2420_v56  ;;  %v4107_v56 = vld [vmem:[#allocation5 + $0x58] sm:$0xff] }
 0xb59   :  { %4783 = vmatprep.subr.mxu1 %v5137_v54 }
 0xb5a   :  { %v5042_v18 = vpop.eup %5041 }
 0xb5b   :  { %v3117_v51 = vmul.f32 %v5042_v18, %v5565_v20  ;;  %v2424_v63 = vpop.permute.xlu1 %2423  ;;  %v4892_v18 = vpack.c.bf16 %v4107_v56, %v4106_v35 }
 0xb5d   :  { %4771 = vmatmul.mubr.msk.f32.vlgmr.msra.gmra.mrb[30].mxu0 %vm418_vm2, %v3117_v51  ;;  %v4971_v51 = vpack.i.bf16 %v4105_v33, %v4104_v32 }
 0xb5e   :  { %v5044_v1 = vpop.eup %5043  ;;  %4779 = vmatpush3.msra.mxu0 %v2424_v63  ;;  %4780 = vmatprep.mubr.msk.f32.mxu0 %vm5138_vm1, %v5137_v54  ;;  %v4976_v63 = vpack.i.bf16 %v4107_v56, %v4106_v35 }
 0xb5f   :  { %v3118_v52 = vmul.f32 %v5044_v1, %v5569_v4  ;;  %v2426_v36 = vpop.permute.xlu1 %2425  ;;  %4788 = vmatprep.subr.mxu0 %v5137_v54 }
 0xb61   :  { %4776 = vmatmul.mubr.msk.f32.vlgmr.msra.gmra.mrb[36].mxu1 %vm418_vm2, %v3118_v52 }
 0xb62   :  { %4784 = vmatpush3.msra.mxu1 %v2426_v36  ;;  %4785 = vmatprep.mubr.msk.f32.mxu1 %vm5138_vm1, %v5137_v54 }
 0xb63   :  { %4793 = vmatprep.subr.mxu1 %v5137_v54 }
 0xb84   :  { %v3097_v37 = vpop.xlane.xlu0 %3096 }
 0xb85   :  { %5045 = vrcp.f32 %v3097_v37 }
 0xb88   :  { %v3103_v38 = vpop.xlane.xlu0 %3102 }
 0xb89   :  { %5047 = vrcp.f32 %v3103_v38 }
 0xb8c   :  { %v2430_v42 = vpop.permute.xlu0 %2429 }
 0xb8f   :  { %v5046_v39 = vpop.eup %5045 }
 0xb90   :  { %v3119_v40 = vmul.f32 %v5046_v39, %v5034_v24  ;;  %v3100_v41 = vpop.xlane.xlu1 %3099  ;;  %v3711_v55 = vpop.permute.xlu0 %3710 }
 0xb91   :  { %5049 = vrcp.f32 %v3100_v41 }
 0xb92   :  { %4781 = vmatmul.mubr.msk.f32.vlgmr.msra.gmra.mrb[32].mxu0 %vm418_vm2, %v3119_v40 }
 0xb93   :  { %v5048_v43 = vpop.eup %5047  ;;  %4789 = vmatpush3.msra.mxu0 %v2430_v42  ;;  %4790 = vmatprep.mubr.msk.f32.mxu0 %vm5138_vm1, %v5137_v54  ;;  %v4408_v42 = vld [vmem:[%s5690_s3 + $0x4] ss:$0 sm:$0xff] }
 0xb94   :  { %v3121_v44 = vmul.f32 %v5048_v43, %v5036_v28  ;;  %v3106_v45 = vpop.xlane.xlu1 %3105  ;;  %4798 = vmatprep.subr.mxu0 %v3711_v55  ;;  %v3882_v4 = vpop.permute.xlu0 %3881 }
 0xb95   :  { %5051 = vrcp.f32 %v3106_v45 }
 0xb96   :  { %4791 = vmatmul.mubr.msk.f32.vlgmr.msra.gmra.mrb[34].mxu0 %vm418_vm2, %v3121_v44 }
 0xb97   :  { %4799 = vmatpush3.msra.mxu0 %v3711_v55 }
 0xb98   :  { %v2432_v50 = vpop.permute.xlu1 %2431 }
 0xb9b   :  { %v5050_v46 = vpop.eup %5049 }
 0xb9c   :  { %v3120_v49 = vmul.f32 %v5050_v46, %v5038_v27  ;;  %v3796_v57 = vpop.permute.xlu1 %3795  ;;  %v4409_v46 = vld [vmem:[%s5690_s3 + $0x5] ss:$0 sm:$0xff] }
 0xb9d   :  { %4803 = vmatprep.subr.mxu0 %v3796_v57 }
 0xb9e   :  { %4786 = vmatmul.mubr.msk.f32.vlgmr.msra.gmra.mrb[38].mxu1 %vm418_vm2, %v3120_v49 }
 0xb9f   :  { %v5052_v53 = vpop.eup %5051  ;;  %4794 = vmatpush3.msra.mxu1 %v2432_v50  ;;  %4795 = vmatprep.mubr.msk.f32.mxu1 %vm5138_vm1, %v5137_v54 }
 0xba0   :  { %v3122_v0 = vmul.f32 %v5052_v53, %v5040_v31  ;;  %v3970_v54 = vpop.permute.xlu1 %3969  ;;  %4889 = vmatprep.subr.bf16.mxu1 %v4888_v34 }
 0xba2   :  { %4796 = vmatmul.mubr.msk.f32.vlgmr.msra.gmra.mrb[40].mxu1 %vm418_vm2, %v3122_v0 }
 0xba3   :  { %4891 = vmatpush3.bf16.msra.mxu1 %v4888_v34 }
 0xba4   :  { %4893 = vmatprep.subr.bf16.mxu1 %v4892_v18 }
 0xba7   :  { %4895 = vmatpush3.bf16.msra.mxu1 %v4892_v18 }
 0xbbc   :  { %v3192_v58 = vpop.f32.mrb[28].mxu0 }
 0xbbd   :  { %v4762_v59 = vpop.f32.mrb[29].mxu0 }
 0xbc0   :  { %v3265_v60 = vpop.f32.mrb[34].mxu1 }
 0xbc1   :  { %v4767_v61 = vpop.f32.mrb[35].mxu1 }
 0xc30   :  { %v3338_v22 = vpop.f32.mrb[30].mxu0 }
 0xc31   :  { %v4772_v20 = vpop.f32.mrb[31].mxu0  ;;  %4800 = vmatprep.mubr.msk.f32.mxu0 %vm418_vm2, %v3338_v22 }
 0xc32   :  { %v4410_v20 = vld [vmem:[%s5690_s3 + $0xe] ss:$0 sm:$0xff] }
 0xc34   :  { %v3411_v5 = vpop.f32.mrb[36].mxu1 }
 0xc35   :  { %v4777_v62 = vpop.f32.mrb[37].mxu1  ;;  %4801 = vmatmul.mubr.msk.f32.vlgmr.msra.gmra.mrb[36].mxu0 %vm418_vm2, %v3411_v5 }
 0xc36   :  { %4805 = vmatprep.mubr.msk.f32.mxu0 %vm418_vm2, %v3192_v58  ;;  %4804 = vmatpush3.msra.mxu0 %v3796_v57 }
 0xc37   :  { %4808 = vmatprep.subr.mxu0 %v3882_v4 }
 0xc3d   :  { %4806 = vmatmul.mubr.msk.f32.vlgmr.msra.gmra.mrb[36].mxu0 %vm418_vm2, %v3265_v60 }
 0xc3e   :  { %4809 = vmatpush3.msra.mxu0 %v3882_v4 }
 0xc3f   :  { %4813 = vmatprep.subr.mxu0 %v3970_v54 }
 0xc65   :  { %v3484_v17 = vpop.f32.mrb[32].mxu0 }
 0xc66   :  { %v4782_v2 = vpop.f32.mrb[33].mxu0  ;;  %4810 = vmatprep.mubr.msk.f32.mxu0 %vm418_vm2, %v3484_v17 }
 0xc69   :  { %v3630_v3 = vpop.f32.mrb[34].mxu0 }
 0xc6a   :  { %v4792_v6 = vpop.f32.mrb[35].mxu0 }
 0xc71   :  { %v3557_v7 = vpop.f32.mrb[38].mxu1 }
 0xc72   :  { %v4787_v8 = vpop.f32.mrb[39].mxu1  ;;  %4811 = vmatmul.mubr.msk.f32.vlgmr.msra.gmra.mrb[36].mxu0 %vm418_vm2, %v3557_v7 }
 0xc73   :  { %4814 = vmatpush3.msra.mxu0 %v3970_v54  ;;  %4815 = vmatprep.mubr.msk.f32.mxu0 %vm418_vm2, %v3630_v3  ;;  %v4413_v3 = vld [vmem:[%s5690_s3 + $0xf] ss:$0 sm:$0xff] }
 0xc75   :  { %v3703_v9 = vpop.f32.mrb[40].mxu1 }
 0xc76   :  { %v4797_v10 = vpop.f32.mrb[41].mxu1 }
 0xc7a   :  { %4816 = vmatmul.mubr.msk.f32.vlgmr.msra.gmra.mrb[36].mxu0 %vm418_vm2, %v3703_v9 }
 0xd4d   :  { %v4817_v12 = vpop.f32.mrb[36].mxu0 }
 0xd4e   :  { %v4061_v13 = vadd.f32 %v4817_v12, %v4407_v11  ;;  %v4044_v14 = vpop.f32.mrb[37].mxu0 }
 0xd4f   :  { %v4060_v15 = vadd.f32 %v4407_v11, %v4044_v14 }
 0xd50   :  { %v5637_v16 = vadd.f32 %v4061_v13, %v5423_v47 }
 0xd51   :  { %v5640_v19 = vadd.f32 %v4060_v15, %v5426_v48 }
 0xd52   :  { %v4069_v21 = vsel %vm52_vm0, %v5637_v16, 0.0 }
 0xd53   :  { %4070 = vadd.xlane.f32.xlu1 %v4069_v21  ;;  %v4066_v23 = vsel %vm52_vm0, %v5640_v19, 0.0 }
 0xd54   :  { %4067 = vadd.xlane.f32.xlu0 %v4066_v23 }
 0xd64   :  { %4977 = vrot.lane.b32.xlu1 %v4976_v63, %s5135_s2 }
 0xde0   :  { %v4071_v24 = vpop.xlane.xlu1 %4070 }
 0xde1   :  { %v4073_v25 = vmul.f32 0.03125, %v4071_v24  ;;  %v4068_v26 = vpop.xlane.xlu0 %4067 }
 0xde2   :  { %v4072_v28 = vmul.f32 0.03125, %v4068_v26 }
 0xde3   :  { %v4075_v29 = vsub.f32 %v5637_v16, %v4073_v25 }
 0xde4   :  { %v4074_v47 = vsub.f32 %v5640_v19, %v4072_v28  ;;  %v4978_v50 = vpop.permute.xlu1 %4977 }
 0xde5   :  { %v4077_v30 = vmul.f32 %v4075_v29, %v4075_v29  ;;  %v4980_v58 = vunpack.i.h.bf16 %v4978_v50  ;;  %v4979_v59 = vunpack.i.l.bf16 %v4978_v50 }
 0xde6   :  { %v4076_v27 = vmul.f32 %v4074_v47, %v4074_v47 }
 0xde7   :  { %v4081_v31 = vsel %vm52_vm0, %v4077_v30, 0.0  ;;  %v4900_v22 = vpack.c.bf16 %v4980_v58, %v4979_v59 }
 0xde8   :  { %v4078_v48 = vsel %vm52_vm0, %v4076_v27, 0.0 }
 0xde9   :  { %4079 = vadd.xlane.f32.xlu0 %v4078_v48 }
 0xded   :  { %4082 = vadd.xlane.f32.xlu0 %v4081_v31 }
 0xe03   :  { %4972 = vrot.lane.b32.xlu0 %v4971_v51, %s5135_s2 }
 0xe76   :  { %v4080_v1 = vpop.xlane.xlu0 %4079 }
 0xe77   :  { %v4084_v52 = vmul.f32 0.03125, %v4080_v1 }
 0xe79   :  { %v4086_v36 = vadd.f32 1e-06, %v4084_v52 }
 0xe7a   :  { %v4083_v37 = vpop.xlane.xlu0 %4082 }
 0xe7b   :  { %5053 = vrsqrt.f32 %v4086_v36  ;;  %v4085_v38 = vmul.f32 0.03125, %v4083_v37 }
 0xe7d   :  { %v4087_v39 = vadd.f32 1e-06, %v4085_v38 }
 0xe7e   :  { %v4973_v40 = vpop.permute.xlu0 %4972 }
 0xe7f   :  { %5055 = vrsqrt.f32 %v4087_v39  ;;  %v4975_v43 = vunpack.i.h.bf16 %v4973_v40  ;;  %v4974_v44 = vunpack.i.l.bf16 %v4973_v40 }
 0xe81   :  { %v4896_v49 = vpack.c.bf16 %v4975_v43, %v4974_v44 }
 0xe83   :  { %4897 = vmatprep.subr.bf16.mxu1 %v4896_v49 }
 0xe85   :  { %v5054_v41 = vpop.eup %5053 }
 0xe86   :  { %v4090_v45 = vmul.f32 %v5054_v41, %v4074_v47 }
 0xe88   :  { %v4096_v53 = vmul.f32 %v4408_v42, %v4090_v45 }
 0xe89   :  { %v5056_v0 = vpop.eup %5055 }
 0xe8a   :  { %v4091_v55 = vmul.f32 %v5056_v0, %v4075_v29  ;;  %v4102_v57 = vadd.f32 %v4409_v46, %v4096_v53 }
 0xe8c   :  { %v4097_v60 = vmul.f32 %v4408_v42, %v4091_v55  ;;  %4826 = vmatprep.mubr.msk.f32.mxu1 %vm52_vm0, %v4102_v57 }
 0xe8e   :  { %v4103_v61 = vadd.f32 %v4409_v46, %v4097_v60 }
 0xe90   :  { %4827 = vmatmul.mubr.msk.f32.vlgmr.msra.gmra.mrb[42].mxu1 %vm52_vm0, %v4103_v61 }
 0xe91   :  { %4899 = vmatpush3.bf16.msra.mxu1 %v4896_v49 }
 0xe92   :  { %4901 = vmatprep.subr.bf16.mxu1 %v4900_v22 }
 0xe95   :  { %4903 = vmatpush3.bf16.msra.mxu1 %v4900_v22 }
 0xf63   :  { %v4828_v5 = vpop.f32.mrb[42].mxu1 }
 0xf64   :  { %v4191_v4 = vadd.f32 %v4828_v5, %v4410_v20  ;;  %v4185_v62 = vpop.f32.mrb[43].mxu1 }
 0xf65   :  { %v4186_v54 = vadd.f32 %v4410_v20, %v4185_v62 }
 0xf66   :  { %v4195_v2 = vmax.f32 %v4191_v4, 0.0 }
 0xf67   :  { %v4194_v17 = vmax.f32 %v4186_v54, 0.0 }
 0xf69   :  { %4837 = vmatprep.mubr.msk.f32.mxu1 %vm52_vm0, %v4194_v17 }
 0xf6a   :  { %4838 = vmatmul.mubr.msk.f32.vlgmr.msra.gmra.mrb[44].mxu1 %vm52_vm0, %v4195_v2 }
0x103d   :  { %v4839_v6 = vpop.f32.mrb[44].mxu1 }
0x103e   :  { %v4295_v7 = vadd.f32 %v4839_v6, %v4413_v3  ;;  %v4289_v8 = vpop.f32.mrb[45].mxu1 }
0x103f   :  { %v4290_v9 = vadd.f32 %v4413_v3, %v4289_v8 }
0x1040   :  { %v4299_v10 = vadd.f32 %v4295_v7, %v5637_v16 }
0x1041   :  { %v4298_v11 = vadd.f32 %v4290_v9, %v5640_v19 }
0x1042   :  { %4301 = vst.msk [vmem:[#allocation7 + $0x8] sm:$0xff] %vm52_vm0, %v4299_v10 }
0x1043   :  { %4300 = vst.msk [vmem:[#allocation7] sm:$0xff] %vm52_vm0, %v4298_v11 }
0x1044   :  { %5112 = shalt.err (!%p5109_p6)
}
0x1045   :  { %s5113_s10 = scalar_lea.hbm %s5691_s4, 256 }
0x1046   :  { %p5114_p7 = scmp.ne.s32.totalorder %s5691_s4, %s5113_s10  ;;  %p5117_p8 = scmp.lt.u32.totalorder %s5113_s10, %s5691_s4 }
0x1048   :  { %p5119_p9 = pnand %p5117_p8, %p5114_p7 }
0x104a   :  { %5122 = shalt.err (!%p5119_p9)
}
0x104b   :  { %4313 = dma.vmem_to_hbm [thread:$0]  %s4308_s7, 256, %s5691_s4, [#allocation4], %s5130_s25, %s5130_s25, %s5131_s26  }
0x104c   :  { %5127 = dma.done.wait [#allocation4], 256  }
0x104d   :  { %5128 = vsyncadd [#allocation4], 4294967040 }
0x104e   :  { %4317 = vsyncpa [#allocation3], 1 }
0x104f   :  { %4318 = vsyncpa [#allocation6], 1 }
0x1050   :  { %4319 = vsyncpa [#allocation4], 1 }

</bundles_post_ra>
